<compile_context>
chip_gen: v7x
topology: tpu7x:2x2x1
jax: 0.10.0
libtpu: 0.0.40
codegen_flags: <defaults>
</compile_context>

<pallas_src>
import functools

import numpy as np
import jax
import jax.numpy as jnp
from jax.experimental import pallas as pl
from jax.experimental.pallas import tpu as pltpu


# -----------------------------------------------------------------------------
# Anchor generation (setup glue, plain JAX) — mirrors BBoxPrior.generate_*
# -----------------------------------------------------------------------------
def generate_base_anchors(layouts):
    strides, anchors = [], []
    for item in layouts:
        stride = float(item["stride"])
        scales = jnp.asarray(item["scales"], jnp.float32) * stride
        aspects = jnp.asarray(item["aspects"], jnp.float32)
        sizes = scales[:, None] * jnp.ones((1, 2), jnp.float32)                 # (S, 2)
        ratios = jnp.stack([jnp.sqrt(aspects), 1.0 / jnp.sqrt(aspects)], -1)    # (A, 2)
        sizes = ratios[None, :, :] * sizes[:, None, :]                          # (S, A, 2)
        sizes = sizes.reshape(-1, 2)
        centers = jnp.zeros_like(sizes)
        anchors.append(jnp.concatenate([centers, sizes], axis=-1))              # (S*A, 4) cx,cy,w,h
        strides.append(stride)
    return strides, anchors


def generate_layer_anchors(stride, fsize, layout):
    """torch ordering: anchor index = h*W*A + w*A + a (used by the reference)."""
    fw, fh = fsize
    vx = (jnp.arange(fw, dtype=jnp.float32) + 0.5) * stride
    vy = (jnp.arange(fh, dtype=jnp.float32) + 0.5) * stride
    vy_g, vx_g = jnp.meshgrid(vy, vx, indexing="ij")                            # (fh, fw)
    offsets = jnp.stack([vx_g, vy_g], axis=-1)                                  # (fh, fw, 2)
    num_a = layout.shape[0]
    anchors = jnp.broadcast_to(layout[None, None], (fh, fw, num_a, 4))
    offsets4 = jnp.concatenate(
        [offsets[:, :, None, :], jnp.zeros((fh, fw, 1, 2), jnp.float32)], axis=-1)
    anchors = anchors + offsets4
    return anchors.reshape(-1, 4)


def generate_anchors(strides, fsizes, layouts):
    out = []
    for stride, fsize, layout in zip(strides, fsizes, layouts):
        out.append(generate_layer_anchors(stride, fsize, layout))
    return jnp.concatenate(out, axis=0)                                         # (N, 4)


def generate_layer_anchors_amajor(stride, fsize, layout):
    """Kernel ordering: anchor index = a*H*W + h*W + w (contiguous input transpose)."""
    fw, fh = fsize
    vx = (jnp.arange(fw, dtype=jnp.float32) + 0.5) * stride
    vy = (jnp.arange(fh, dtype=jnp.float32) + 0.5) * stride
    vy_g, vx_g = jnp.meshgrid(vy, vx, indexing="ij")                            # (fh, fw)
    offsets = jnp.stack([vx_g, vy_g], axis=-1)                                  # (fh, fw, 2)
    offsets4 = jnp.concatenate([offsets, jnp.zeros((fh, fw, 2), jnp.float32)], -1)
    anchors = layout[:, None, None, :] + offsets4[None]                         # (A, fh, fw, 4)
    return anchors.reshape(-1, 4)


def prepare_anchors(strides, fsizes, layouts):
    """Anchor-last (4, N) A-major anchors; call once per feature-map config."""
    per = [generate_layer_anchors_amajor(s, f, l)
           for s, f, l in zip(strides, fsizes, layouts)]
    return jnp.transpose(jnp.concatenate(per, axis=0), (1, 0))                  # (4, N)


def _round_up(x, m):
    return ((x + m - 1) // m) * m


# -----------------------------------------------------------------------------
# Pallas kernel: sigmoid + bbox decode + point decode on a fused feature block
# -----------------------------------------------------------------------------
def _decode_kernel(num_classes, num_points, enc_mean, enc_std,
                   x_ref, anchors_ref, out_ref):
    C = num_classes
    twoP = 2 * num_points
    f32 = jnp.float32

    # bf16 heads upcast in-kernel (rides the non-binding VALU slot).
    x = x_ref[...].astype(f32)                    # (B, F, TN)
    a = anchors_ref[...]                          # (4, TN): cx, cy, w, h
    acx = a[0:1, :][None]                         # (1, 1, TN)
    acy = a[1:2, :][None]
    aw = a[2:3, :][None]
    ah = a[3:4, :][None]
    a_ctr = a[0:2, :][None]                       # (1, 2, TN)
    a_sz = a[2:4, :][None]                        # (1, 2, TN)

    m0, m1, m2, m3 = enc_mean
    s0, s1, s2, s3 = enc_std

    # --- class scores: sigmoid(logits) ---
    scores = jax.nn.sigmoid(x[:, :C, :])

    # Per-row de-normalization constants built from an in-kernel iota parity
    # mask blended with Python-float scalars (no captured array constants).
    even2 = ((jax.lax.broadcasted_iota(jnp.int32, (1, 2, 1), 1) % 2) == 0).astype(f32)
    std_xy = s1 + (s0 - s1) * even2               # rows (s0, s1)
    mean_xy = m1 + (m0 - m1) * even2
    std_wh = s3 + (s2 - s3) * even2               # rows (s2, s3)
    mean_wh = m3 + (m2 - m3) * even2

    # --- bbox decode: cxcywh -> x1y1x2y2 ---
    d_ctr = x[:, C:C + 2, :] * std_xy + mean_xy   # (B, 2, TN): dx, dy
    d_sz = x[:, C + 2:C + 4, :] * std_wh + mean_wh  # (B, 2, TN): dw, dh
    ctr = d_ctr * a_sz + a_ctr
    half_sz = 0.5 * jnp.exp(d_sz) * a_sz

    # --- point decode: even rows = x (s0, w, cx), odd rows = y (s1, h, cy) ---
    evenp = (jax.lax.broadcasted_iota(jnp.int32, (1, twoP, 1), 1) % 2) == 0
    evenp_f = evenp.astype(f32)
    std_pt = s1 + (s0 - s1) * evenp_f
    mean_pt = m1 + (m0 - m1) * evenp_f
    size_sel = jnp.where(evenp, aw, ah)           # (1, 2P, TN), pure VPU select
    cen_sel = jnp.where(evenp, acx, acy)
    pts = (x[:, C + 4:, :] * std_pt + mean_pt) * size_sel + cen_sel

    # Single full-tile store (avoids masked vst at non-8-aligned sublane splits).
    out_ref[...] = jnp.concatenate(
        [scores, ctr - half_sz, ctr + half_sz, pts], axis=1)


# -----------------------------------------------------------------------------
# Forward wrapper (BBoxShapePrior.forward, predictions-only branch)
# -----------------------------------------------------------------------------
@functools.partial(
    jax.jit,
    static_argnames=("enc_mean", "enc_std", "num_classes", "num_points",
                     "tile_n", "anchor_last"))
def _forward_impl(predictions, anchors_cl, *, enc_mean, enc_std,
                  num_classes, num_points, tile_n, anchor_last):
    B = predictions[0][0].shape[0]
    C, P = num_classes, num_points
    F = C + 4 + 2 * P

    # NCHW heads -> fused A-major anchor-last (B, F, N).  The transpose swaps
    # two non-minor dims; the minor H*W dim stays contiguous, so XLA does a
    # near-contiguous copy instead of a lane-sparse scattered transpose.
    level_dims = []
    per_level = []
    for logit, delta, shape in predictions:
        H, W = logit.shape[-2], logit.shape[-1]
        A = logit.shape[1] // C
        level_dims.append((H, W, A))
        lvl = jnp.concatenate(
            [logit.reshape(B, A, C, H * W),
             delta.reshape(B, A, 4, H * W),
             shape.reshape(B, A, 2 * P, H * W)], axis=2)          # (B, A, F, HW)
        lvl = jnp.transpose(lvl, (0, 2, 1, 3)).reshape(B, F, A * H * W)
        per_level.append(lvl)
    fused = jnp.concatenate(per_level, axis=-1)                   # (B, F, N), N=(lvl,a,h,w)
    N = fused.shape[-1]

    # Big tile to amortize the ~0.35us/step pipeline overhead, but keep >=2
    # grid steps so v7x's two TensorCores both get work ("parallel" axis).
    # At tile=16384, f32: double-buffered blocks ~8.4 MiB (< v5e's 16 MiB default).
    half_n = _round_up(pl.cdiv(N, 2), 128)
    tile = min(tile_n, half_n)
    grid = (pl.cdiv(N, tile),)                                    # remainder block masked by Pallas

    kernel = functools.partial(_decode_kernel, C, P, enc_mean, enc_std)
    out = pl.pallas_call(
        kernel,
        out_shape=jax.ShapeDtypeStruct((B, F, N), jnp.float32),
        grid_spec=pltpu.PrefetchScalarGridSpec(
            num_scalar_prefetch=0,
            grid=grid,
            in_specs=[
                pl.BlockSpec((B, F, tile), lambda i: (0, 0, i)),
                pl.BlockSpec((4, tile), lambda i: (0, i)),
            ],
            out_specs=pl.BlockSpec((B, F, tile), lambda i: (0, 0, i)),
        ),
        compiler_params=pltpu.CompilerParams(dimension_semantics=("parallel",)),
    )(fused, anchors_cl)

    if anchor_last:
        # Anchor-last outputs in kernel (level, a, h, w) anchor order; skips
        # the final HBM pass for downstream consumers that can take it.
        scores = out[:, :C, :]                                    # (B, C, N)
        bboxes = out[:, C:C + 4, :]                               # (B, 4, N)
        points = out[:, C + 4:, :].reshape(B, P, 2, N)            # (B, P, 2, N)
        return scores, bboxes, points

    # Restore torch output ordering (level, h, w, a) with one fused per-level
    # transpose (same HBM cost as a single (B,F,N)->(B,N,F) pass).
    outs = []
    off = 0
    for (H, W, A) in level_dims:
        n_l = A * H * W
        o_l = jax.lax.slice_in_dim(out, off, off + n_l, axis=2)   # (B, F, A*HW)
        o_l = o_l.reshape(B, F, A, H * W)
        o_l = jnp.transpose(o_l, (0, 3, 2, 1)).reshape(B, H * W * A, F)
        outs.append(o_l)
        off += n_l
    out_bn = jnp.concatenate(outs, axis=1)                        # (B, N, F)

    scores = out_bn[..., :C]
    bboxes = out_bn[..., C:C + 4]
    points = out_bn[..., C + 4:].reshape(B, -1, P, 2)
    return scores, bboxes, points


def bbox_shape_prior_forward(predictions, strides, layouts, encode_mean, encode_std,
                             num_classes=1, num_points=5, tile_n=16384,
                             anchors_cl=None, anchor_last=False):
    if anchors_cl is None:
        fsizes = [(p[0].shape[-1], p[0].shape[-2]) for p in predictions]
        anchors_cl = prepare_anchors(strides, fsizes, layouts)
    if encode_mean is None:
        encode_mean = np.zeros((4,), np.float32)
    if encode_std is None:
        encode_std = np.ones((4,), np.float32)
    enc_mean = tuple(float(v) for v in np.asarray(encode_mean).reshape(-1))
    enc_std = tuple(float(v) for v in np.asarray(encode_std).reshape(-1))
    preds = tuple(tuple(p) for p in predictions)
    return _forward_impl(preds, anchors_cl,
                         enc_mean=enc_mean, enc_std=enc_std,
                         num_classes=num_classes, num_points=num_points,
                         tile_n=tile_n, anchor_last=anchor_last)


# -----------------------------------------------------------------------------
# Pure-JAX reference (mirrors the torch semantics) for validation
# -----------------------------------------------------------------------------
def reference_forward(predictions, strides, layouts, encode_mean, encode_std,
                      num_classes, num_points):
    B = predictions[0][0].shape[0]
    logits, pred_deltas, pred_shapes, fsizes = [], [], [], []
    for logit, delta, shape in predictions:
        h, w = logit.shape[-2], logit.shape[-1]
        fsizes.append((w, h))
        logits.append(jnp.transpose(logit, (0, 2, 3, 1)).reshape(B, -1, num_classes))
        pred_deltas.append(jnp.transpose(delta, (0, 2, 3, 1)).reshape(B, -1, 4))
        pred_shapes.append(jnp.transpose(shape, (0, 2, 3, 1)).reshape(B, -1, num_points, 2))
    logits = jnp.concatenate(logits, 1)
    pred_deltas = jnp.concatenate(pred_deltas, 1)
    pred_shapes = jnp.concatenate(pred_shapes, 1)
    anchors = generate_anchors(strides, fsizes, layouts)

    scores = jax.nn.sigmoid(logits)
    d = pred_deltas * encode_std + encode_mean
    sizes = jnp.exp(d[..., 2:]) * anchors[..., 2:]
    centers = d[..., :2] * anchors[..., 2:] + anchors[..., :2]
    bboxes = jnp.concatenate([centers - 0.5 * sizes, centers + 0.5 * sizes], axis=-1)
    s = pred_shapes * encode_std[:2] + encode_mean[:2]
    points = s * anchors[:, None, 2:] + anchors[:, None, :2]
    return scores, bboxes, points


if __name__ == "__main__":
    key = jax.random.PRNGKey(0)
    B, num_classes, num_points = 2, 1, 5
    anchor_layouts = [
        dict(stride=8, scales=[1.0, 2.0], aspects=[1.0]),
        dict(stride=16, scales=[1.0, 2.0], aspects=[1.0]),
    ]
    encode_mean = np.zeros((4,), np.float32)
    encode_std = np.array([0.1, 0.1, 0.2, 0.2], np.float32)
    strides, layouts = generate_base_anchors(anchor_layouts)

    # per-level NCHW prediction heads: A=2 anchors/location
    fmap_hw = [(16, 16), (8, 8)]
    predictions = []
    for (H, W), layout in zip(fmap_hw, layouts):
        A = layout.shape[0]
        key, k1, k2, k3 = jax.random.split(key, 4)
        logit = jax.random.normal(k1, (B, A * num_classes, H, W), jnp.float32)
        delta = jax.random.normal(k2, (B, A * 4, H, W), jnp.float32)
        shape = jax.random.normal(k3, (B, A * num_points * 2, H, W), jnp.float32)
        predictions.append((logit, delta, shape))

    # anchors hoisted out of the per-call path (A-major, anchor-last)
    fsizes = [(p[0].shape[-1], p[0].shape[-2]) for p in predictions]
    anchors_cl = prepare_anchors(strides, fsizes, layouts)        # (4, N)

    scores, bboxes, points = bbox_shape_prior_forward(
        predictions, strides, layouts, encode_mean, encode_std,
        num_classes=num_classes, num_points=num_points, anchors_cl=anchors_cl)
    jax.block_until_ready((scores, bboxes, points))

    ref_scores, ref_bboxes, ref_points = reference_forward(
        predictions, strides, layouts, jnp.asarray(encode_mean), jnp.asarray(encode_std),
        num_classes, num_points)

    N_total = 16 * 16 * 2 + 8 * 8 * 2
    assert scores.shape == (B, N_total, num_classes)
    assert bboxes.shape == (B, N_total, 4)
    assert points.shape == (B, N_total, num_points, 2)
    assert jnp.allclose(scores, ref_scores, atol=1e-5), "score mismatch"
    assert jnp.allclose(bboxes, ref_bboxes, atol=1e-4), "bbox mismatch"
    assert jnp.allclose(points, ref_points, atol=1e-4), "point mismatch"
    print("KERNEL_OK")
</pallas_src>

<mosaic_0001>
module attributes {stable_mosaic.version = 11 : i64} {
  func.func @_decode_kernel(%arg0: i32, %arg1: memref<2x15x384xf32, #tpu.memory_space<vmem>>, %arg2: memref<4x384xf32, #tpu.memory_space<vmem>>, %arg3: memref<2x15x384xf32, #tpu.memory_space<vmem>>) attributes {dimension_semantics = [#tpu.dimension_semantics<parallel>], iteration_bounds = array<i64: 2>, scalar_prefetch = 0 : i64, scratch_operands = 0 : i64, tpu.core_type = #tpu.core_type<tc>, window_params = [{transform_indices = @transform_0, window_bounds = array<i64: 2, 15, 384>}, {transform_indices = @transform_1, window_bounds = array<i64: 4, 384>}, {transform_indices = @transform_2, window_bounds = array<i64: 2, 15, 384>}]} {
    %c0 = arith.constant 0 : index
    %c0_0 = arith.constant 0 : index
    %c0_1 = arith.constant 0 : index
    %0 = vector.load %arg1[%c0, %c0_0, %c0_1] : memref<2x15x384xf32, #tpu.memory_space<vmem>>, vector<2x15x384xf32>
    %c0_2 = arith.constant 0 : index
    %c0_3 = arith.constant 0 : index
    %1 = vector.load %arg2[%c0_2, %c0_3] : memref<4x384xf32, #tpu.memory_space<vmem>>, vector<4x384xf32>
    %2 = vector.extract_strided_slice %1 {offsets = [0, 0], sizes = [1, 384], strides = [1, 1]} : vector<4x384xf32> to vector<1x384xf32>
    %3 = vector.shape_cast %2 : vector<1x384xf32> to vector<1x1x384xf32>
    %4 = vector.extract_strided_slice %1 {offsets = [1, 0], sizes = [1, 384], strides = [1, 1]} : vector<4x384xf32> to vector<1x384xf32>
    %5 = vector.shape_cast %4 : vector<1x384xf32> to vector<1x1x384xf32>
    %6 = vector.extract_strided_slice %1 {offsets = [2, 0], sizes = [1, 384], strides = [1, 1]} : vector<4x384xf32> to vector<1x384xf32>
    %7 = vector.shape_cast %6 : vector<1x384xf32> to vector<1x1x384xf32>
    %8 = vector.extract_strided_slice %1 {offsets = [3, 0], sizes = [1, 384], strides = [1, 1]} : vector<4x384xf32> to vector<1x384xf32>
    %9 = vector.shape_cast %8 : vector<1x384xf32> to vector<1x1x384xf32>
    %10 = vector.extract_strided_slice %1 {offsets = [0, 0], sizes = [2, 384], strides = [1, 1]} : vector<4x384xf32> to vector<2x384xf32>
    %11 = vector.shape_cast %10 : vector<2x384xf32> to vector<1x2x384xf32>
    %12 = vector.extract_strided_slice %1 {offsets = [2, 0], sizes = [2, 384], strides = [1, 1]} : vector<4x384xf32> to vector<2x384xf32>
    %13 = vector.shape_cast %12 : vector<2x384xf32> to vector<1x2x384xf32>
    %14 = vector.extract_strided_slice %0 {offsets = [0, 0, 0], sizes = [2, 1, 384], strides = [1, 1, 1]} : vector<2x15x384xf32> to vector<2x1x384xf32>
    %15 = arith.negf %14 : vector<2x1x384xf32>
    %16 = math.exp %15 : vector<2x1x384xf32>
    %cst = arith.constant 1.000000e+00 : f32
    %17 = vector.broadcast %cst : f32 to vector<2x1x384xf32>
    %18 = arith.addf %17, %16 : vector<2x1x384xf32>
    %19 = arith.divf %17, %18 : vector<2x1x384xf32>
    %20 = tpu.iota {dimensions = array<i32: 1>} : vector<1x2x1xi32>
    %c2_i32 = arith.constant 2 : i32
    %c0_i32 = arith.constant 0 : i32
    %21 = arith.cmpi eq, %c2_i32, %c0_i32 : i32
    %c1_i32 = arith.constant 1 : i32
    %22 = arith.select %21, %c1_i32, %c2_i32 : i32
    %23 = vector.broadcast %22 : i32 to vector<1x2x1xi32>
    %24 = arith.remsi %20, %23 : vector<1x2x1xi32>
    %c0_i32_4 = arith.constant 0 : i32
    %25 = vector.broadcast %c0_i32_4 : i32 to vector<1x2x1xi32>
    %26 = arith.cmpi ne, %24, %25 : vector<1x2x1xi32>
    %c0_i32_5 = arith.constant 0 : i32
    %27 = vector.broadcast %c0_i32_5 : i32 to vector<1x2x1xi32>
    %28 = arith.cmpi slt, %24, %27 : vector<1x2x1xi32>
    %c0_i32_6 = arith.constant 0 : i32
    %29 = arith.cmpi slt, %22, %c0_i32_6 : i32
    %30 = vector.broadcast %29 : i1 to vector<1x2x1xi1>
    %31 = vector.broadcast %30 : vector<1x2x1xi1> to vector<1x2x1xi1>
    %32 = arith.xori %28, %31 : vector<1x2x1xi1>
    %33 = arith.andi %32, %26 : vector<1x2x1xi1>
    %34 = vector.broadcast %22 : i32 to vector<1x2x1xi32>
    %35 = arith.addi %24, %34 : vector<1x2x1xi32>
    %36 = arith.select %33, %35, %24 : vector<1x2x1xi1>, vector<1x2x1xi32>
    %c0_i32_7 = arith.constant 0 : i32
    %37 = vector.broadcast %c0_i32_7 : i32 to vector<1x2x1xi32>
    %38 = arith.cmpi eq, %36, %37 : vector<1x2x1xi32>
    %39 = arith.extui %38 : vector<1x2x1xi1> to vector<1x2x1xi32>
    %40 = arith.sitofp %39 : vector<1x2x1xi32> to vector<1x2x1xf32>
    %cst_8 = arith.constant 0.000000e+00 : f32
    %41 = vector.broadcast %cst_8 : f32 to vector<1x2x1xf32>
    %42 = arith.mulf %41, %40 : vector<1x2x1xf32>
    %cst_9 = arith.constant 1.000000e-01 : f32
    %43 = vector.broadcast %cst_9 : f32 to vector<1x2x1xf32>
    %44 = arith.addf %43, %42 : vector<1x2x1xf32>
    %cst_10 = arith.constant 0.000000e+00 : f32
    %45 = vector.broadcast %cst_10 : f32 to vector<1x2x1xf32>
    %46 = arith.mulf %45, %40 : vector<1x2x1xf32>
    %cst_11 = arith.constant 0.000000e+00 : f32
    %47 = vector.broadcast %cst_11 : f32 to vector<1x2x1xf32>
    %48 = arith.addf %47, %46 : vector<1x2x1xf32>
    %cst_12 = arith.constant 0.000000e+00 : f32
    %49 = vector.broadcast %cst_12 : f32 to vector<1x2x1xf32>
    %50 = arith.mulf %49, %40 : vector<1x2x1xf32>
    %cst_13 = arith.constant 2.000000e-01 : f32
    %51 = vector.broadcast %cst_13 : f32 to vector<1x2x1xf32>
    %52 = arith.addf %51, %50 : vector<1x2x1xf32>
    %cst_14 = arith.constant 0.000000e+00 : f32
    %53 = vector.broadcast %cst_14 : f32 to vector<1x2x1xf32>
    %54 = arith.mulf %53, %40 : vector<1x2x1xf32>
    %cst_15 = arith.constant 0.000000e+00 : f32
    %55 = vector.broadcast %cst_15 : f32 to vector<1x2x1xf32>
    %56 = arith.addf %55, %54 : vector<1x2x1xf32>
    %57 = vector.extract_strided_slice %0 {offsets = [0, 1, 0], sizes = [2, 2, 384], strides = [1, 1, 1]} : vector<2x15x384xf32> to vector<2x2x384xf32>
    %58 = vector.broadcast %44 : vector<1x2x1xf32> to vector<2x2x384xf32>
    %59 = arith.mulf %57, %58 : vector<2x2x384xf32>
    %60 = vector.broadcast %48 : vector<1x2x1xf32> to vector<2x2x384xf32>
    %61 = arith.addf %59, %60 : vector<2x2x384xf32>
    %62 = vector.extract_strided_slice %0 {offsets = [0, 3, 0], sizes = [2, 2, 384], strides = [1, 1, 1]} : vector<2x15x384xf32> to vector<2x2x384xf32>
    %63 = vector.broadcast %52 : vector<1x2x1xf32> to vector<2x2x384xf32>
    %64 = arith.mulf %62, %63 : vector<2x2x384xf32>
    %65 = vector.broadcast %56 : vector<1x2x1xf32> to vector<2x2x384xf32>
    %66 = arith.addf %64, %65 : vector<2x2x384xf32>
    %67 = vector.broadcast %13 : vector<1x2x384xf32> to vector<2x2x384xf32>
    %68 = arith.mulf %61, %67 : vector<2x2x384xf32>
    %69 = vector.broadcast %11 : vector<1x2x384xf32> to vector<2x2x384xf32>
    %70 = arith.addf %68, %69 : vector<2x2x384xf32>
    %71 = math.exp %66 : vector<2x2x384xf32>
    %cst_16 = arith.constant 5.000000e-01 : f32
    %72 = vector.broadcast %cst_16 : f32 to vector<2x2x384xf32>
    %73 = arith.mulf %72, %71 : vector<2x2x384xf32>
    %74 = vector.broadcast %13 : vector<1x2x384xf32> to vector<2x2x384xf32>
    %75 = arith.mulf %73, %74 : vector<2x2x384xf32>
    %76 = tpu.iota {dimensions = array<i32: 1>} : vector<1x10x1xi32>
    %c2_i32_17 = arith.constant 2 : i32
    %c0_i32_18 = arith.constant 0 : i32
    %77 = arith.cmpi eq, %c2_i32_17, %c0_i32_18 : i32
    %c1_i32_19 = arith.constant 1 : i32
    %78 = arith.select %77, %c1_i32_19, %c2_i32_17 : i32
    %79 = vector.broadcast %78 : i32 to vector<1x10x1xi32>
    %80 = arith.remsi %76, %79 : vector<1x10x1xi32>
    %c0_i32_20 = arith.constant 0 : i32
    %81 = vector.broadcast %c0_i32_20 : i32 to vector<1x10x1xi32>
    %82 = arith.cmpi ne, %80, %81 : vector<1x10x1xi32>
    %c0_i32_21 = arith.constant 0 : i32
    %83 = vector.broadcast %c0_i32_21 : i32 to vector<1x10x1xi32>
    %84 = arith.cmpi slt, %80, %83 : vector<1x10x1xi32>
    %c0_i32_22 = arith.constant 0 : i32
    %85 = arith.cmpi slt, %78, %c0_i32_22 : i32
    %86 = vector.broadcast %85 : i1 to vector<1x10x1xi1>
    %87 = vector.broadcast %86 : vector<1x10x1xi1> to vector<1x10x1xi1>
    %88 = arith.xori %84, %87 : vector<1x10x1xi1>
    %89 = arith.andi %88, %82 : vector<1x10x1xi1>
    %90 = vector.broadcast %78 : i32 to vector<1x10x1xi32>
    %91 = arith.addi %80, %90 : vector<1x10x1xi32>
    %92 = arith.select %89, %91, %80 : vector<1x10x1xi1>, vector<1x10x1xi32>
    %c0_i32_23 = arith.constant 0 : i32
    %93 = vector.broadcast %c0_i32_23 : i32 to vector<1x10x1xi32>
    %94 = arith.cmpi eq, %92, %93 : vector<1x10x1xi32>
    %95 = arith.extui %94 : vector<1x10x1xi1> to vector<1x10x1xi32>
    %96 = arith.sitofp %95 : vector<1x10x1xi32> to vector<1x10x1xf32>
    %cst_24 = arith.constant 0.000000e+00 : f32
    %97 = vector.broadcast %cst_24 : f32 to vector<1x10x1xf32>
    %98 = arith.mulf %97, %96 : vector<1x10x1xf32>
    %cst_25 = arith.constant 1.000000e-01 : f32
    %99 = vector.broadcast %cst_25 : f32 to vector<1x10x1xf32>
    %100 = arith.addf %99, %98 : vector<1x10x1xf32>
    %cst_26 = arith.constant 0.000000e+00 : f32
    %101 = vector.broadcast %cst_26 : f32 to vector<1x10x1xf32>
    %102 = arith.mulf %101, %96 : vector<1x10x1xf32>
    %cst_27 = arith.constant 0.000000e+00 : f32
    %103 = vector.broadcast %cst_27 : f32 to vector<1x10x1xf32>
    %104 = arith.addf %103, %102 : vector<1x10x1xf32>
    %105 = vector.shape_cast %94 : vector<1x10x1xi1> to vector<1x10x1xi1>
    %106 = vector.broadcast %105 : vector<1x10x1xi1> to vector<1x10x384xi1>
    %107 = vector.shape_cast %7 : vector<1x1x384xf32> to vector<1x1x384xf32>
    %108 = vector.broadcast %107 : vector<1x1x384xf32> to vector<1x10x384xf32>
    %109 = vector.shape_cast %9 : vector<1x1x384xf32> to vector<1x1x384xf32>
    %110 = vector.broadcast %109 : vector<1x1x384xf32> to vector<1x10x384xf32>
    %111 = arith.select %106, %108, %110 : vector<1x10x384xi1>, vector<1x10x384xf32>
    %112 = vector.shape_cast %94 : vector<1x10x1xi1> to vector<1x10x1xi1>
    %113 = vector.broadcast %112 : vector<1x10x1xi1> to vector<1x10x384xi1>
    %114 = vector.shape_cast %3 : vector<1x1x384xf32> to vector<1x1x384xf32>
    %115 = vector.broadcast %114 : vector<1x1x384xf32> to vector<1x10x384xf32>
    %116 = vector.shape_cast %5 : vector<1x1x384xf32> to vector<1x1x384xf32>
    %117 = vector.broadcast %116 : vector<1x1x384xf32> to vector<1x10x384xf32>
    %118 = arith.select %113, %115, %117 : vector<1x10x384xi1>, vector<1x10x384xf32>
    %119 = vector.extract_strided_slice %0 {offsets = [0, 5, 0], sizes = [2, 10, 384], strides = [1, 1, 1]} : vector<2x15x384xf32> to vector<2x10x384xf32>
    %120 = vector.broadcast %100 : vector<1x10x1xf32> to vector<2x10x384xf32>
    %121 = arith.mulf %119, %120 : vector<2x10x384xf32>
    %122 = vector.broadcast %104 : vector<1x10x1xf32> to vector<2x10x384xf32>
    %123 = arith.addf %121, %122 : vector<2x10x384xf32>
    %124 = vector.broadcast %111 : vector<1x10x384xf32> to vector<2x10x384xf32>
    %125 = arith.mulf %123, %124 : vector<2x10x384xf32>
    %126 = vector.broadcast %118 : vector<1x10x384xf32> to vector<2x10x384xf32>
    %127 = arith.addf %125, %126 : vector<2x10x384xf32>
    %128 = arith.subf %70, %75 : vector<2x2x384xf32>
    %129 = arith.addf %70, %75 : vector<2x2x384xf32>
    %130 = tpu.concatenate %19, %128, %129, %127 in 1 : vector<2x1x384xf32>, vector<2x2x384xf32>, vector<2x2x384xf32>, vector<2x10x384xf32> -> vector<2x15x384xf32>
    %c0_28 = arith.constant 0 : index
    %c0_29 = arith.constant 0 : index
    %c0_30 = arith.constant 0 : index
    %131 = vector.load %arg3[%c0_28, %c0_29, %c0_30] : memref<2x15x384xf32, #tpu.memory_space<vmem>>, vector<2x15x384xf32>
    tpu.vector_store %arg3[%c0_28, %c0_29, %c0_30], %130 {strides = array<i32>} : memref<2x15x384xf32, #tpu.memory_space<vmem>>, vector<2x15x384xf32>,
    return
  }
  func.func @transform_0(%arg0: i32) -> (i32, i32, i32) {
    %c0_i32 = arith.constant 0 : i32
    %c0_i32_0 = arith.constant 0 : i32
    %c0_i32_1 = arith.constant 0 : i32
    return %c0_i32, %c0_i32_0, %arg0 : i32, i32, i32
  }
  func.func @transform_1(%arg0: i32) -> (i32, i32) {
    %c0_i32 = arith.constant 0 : i32
    %c0_i32_0 = arith.constant 0 : i32
    return %c0_i32, %arg0 : i32, i32
  }
  func.func @transform_2(%arg0: i32) -> (i32, i32, i32) {
    %c0_i32 = arith.constant 0 : i32
    %c0_i32_0 = arith.constant 0 : i32
    %c0_i32_1 = arith.constant 0 : i32
    return %c0_i32, %c0_i32_0, %arg0 : i32, i32, i32
  }
}

</mosaic_0001>

<bundles_post_ra>
// kernel: _forward_impl.1
= control target key start
LH: loop header
LB: loop body
LE: loop exit
PB: predicated region body
PF: predicated region fallthrough
CT: control target
= control target key end

     0   :  { %s2476_s9 = smov 0   ;;  %s2478_s10 = smov 0   ;;  %s3550_s0 = inlined_call_operand.vmem [shape: f32[2,15,640], index: 0, kind: input, shape index: {}]   ;;  %s3551_s1 = inlined_call_operand.vmem [shape: f32[4,640], index: 1, kind: input, shape index: {}]   ;;  %s3552_s2 = inlined_call_operand.vmem [shape: f32[2,15,640], index: 2, kind: output, shape index: {}]  }
   0x1   :  { %s2480_s11 = smov 0  }
   0x2 LB: > { %s2492_s12 = sadd.s32 4294967295, %s2326_s11   ;;  %s2495_s13 = sadd.s32 1, %s2326_s11   ;;  %s2326_s11 = sphi %s2480_s11, %s3590_s11   ;;  %s2322_s10 = sphi %s2478_s10, %s3589_s10   ;;  %s2318_s9 = sphi %s2476_s9, %s3588_s9  }
   0x3   : > { %s16_s14 = ssub.s32 %s2326_s11, %s2495_s13  ;;  %s19_s15 = sadd.s32 1, %s2322_s10 }
   0x4   : > { %p17_p0 = scmp.eq.s32.totalorder %s16_s14, 0  ;;  %p26_p1 = scmp.ne.s32.totalorder %s2322_s10, %s2318_s9 }
   0x5   : > { %p27_p2 = scmp.eq.s32.totalorder %s2326_s11, 0  ;;  %p82_p3 = scmp.eq.s32.totalorder %s2492_s12, 1 }
   0x6   : > { %s2505_s16 = scalar_select %p17_p0, %s2322_s10, %s19_s15  }
   0x7   : > { %p28_p4 = por %p27_p2, %p26_p1  ;;  %p2507_p5 = por %p82_p3, %p26_p1 }
   0x8   : > { %p1779_p6 = scmp.ge.s32.totalorder %s2326_s11, 2 }
   0xa   : > { %104 = sbr.rel (%p1779_p6) target bundleno = 153 (0x99), region = 16 }
  0x11   : > { %107 = sbr.rel (!%p28_p4) target bundleno = 153 (0x99), region = 20  ;;  %s109_s18 = sand.u32 (%p28_p4), 1, %s2322_s10  }
  0x12   : > { %s112_s19 = smul.u32 (%p28_p4), 3, %s2326_s11 }
  0x13   : > { %s1852_s20 = smul.u32 (%p28_p4), 96, %s109_s18 }
  0x14   : > { %s113_s21 = ssub.s32 (%p28_p4), 5, %s112_s19  ;;  %s1842_s22 = smul.u32 (%p28_p4), 24, %s2326_s11 }
  0x15   : > { %p114_p7 = scmp.lt.s32.totalorder (%p28_p4), %s113_s21, 3  ;;  %s2522_s28 = scalar_lea.vmem (%p28_p4), [#allocation2], %s1852_s20  }
  0x16   : > { %s2518_s25 = scalar_lea.vmem (%p28_p4), %s3550_s0, %s1842_s22  }
  0x18   : > { %s3592_s21 = smov (!%p114_p7, %s113_s21), 3 }
  0x19   : > { %s1780_s26 = sshll.u32 %s3592_s21, 9  ;;  %s2520_s27 = sshll.u32 %s3592_s21, 3 }
  0x1a   : > { %p1784_p8 = scmp.eq.s32.totalorder %s1780_s26, 0 }
  0x1b   : > { %p124_p9 = scmp.lt.u32.totalorder (!%p1784_p8), %s2520_s27, 8 }
  0x1c   : > { %123 = sbr.rel (%p1784_p8) target bundleno = 153 (0x99), region = 24 }
  0x23   : > { %127 = sbr.rel (%p124_p9) target bundleno = 144 (0x90), region = 28  ;;  %s2526_s29 = sand.u32 (!%p124_p9), 7, %s2520_s27  }
  0x24   : > { %p149_p10 = scmp.eq.s32.totalorder (!%p124_p9), %s2526_s29, 0  ;;  %p1785_p11 = scmp.ne.s32.totalorder (!%p124_p9), %s2526_s29, 0 }
  0x2a   : > { %152 = sbr.rel (%p1785_p11) target bundleno = 90 (0x5a), region = 43  ;;  %s153_s30 = sshrl.u32 (!%p1785_p11), %s2520_s27, 3 }
  0x2b   : > { %s2533_s3 = sshrl.u32 (!%p1785_p11), %s153_s30, 4 }
  0x2c   : > { %p1786_p12 = scmp.le.s32.totalorder (!%p1785_p11), %s2533_s3, 0 }
  0x31   : > { %1643 = sbr.rel (%p1786_p12) target bundleno = 70 (0x46), region = 228  ;;  %s3554_s4 = smov (!%p1786_p12), %s2522_s28 }
  0x32   : > { %s3555_s5 = smov (!%p1786_p12), %s2518_s25  ;;  %s2542_s6 = smov (!%p1786_p12), 0  }
  0x33   : > { %s2544_s7 = smov (!%p1786_p12), 0  }
  0x38 LB: >> { %v196_v0 = vld [vmem:[%s2334_s5 + $0x78] sm:$0xff]  ;;  %v220_v1 = vld [vmem:[%s2334_s5 + $0x80] sm:$0xff]  ;;  %v222_v2 = vld [vmem:[%s2334_s5 + $0x88] sm:$0xff]  ;;  %s294_s8 = sadd.s32 1, %s2338_s6  ;;  %s160_s7 = sadd.s32 1, %s2342_s7   ;;  %s2342_s7 = sphi %s2544_s7, %s160_s7   ;;  %s2338_s6 = sphi %s2542_s6, %s3557_s6   ;;  %s2334_s5 = sphi %s3555_s5, %s299_s5   ;;  %s2330_s4 = sphi %s3554_s4, %s3556_s4  }
  0x39   : >> { %v224_v3 = vld [vmem:[%s2334_s5 + $0x90] sm:$0xff]  ;;  %v226_v4 = vld [vmem:[%s2334_s5 + $0x98] sm:$0xff]  ;;  %v228_v5 = vld [vmem:[%s2334_s5 + $0xa0] sm:$0xff]  ;;  %263 = vst [vmem:[%s2330_s4 + $0x48] sm:$0xff] %v196_v0  ;;  %p295_p13 = scmp.ge.s32.totalorder %s294_s8, %s2533_s3  ;;  %p159_p0 = scmp.ge.s32.totalorder %s160_s7, %s2533_s3 }
  0x3a   : >> { %265 = vst [vmem:[%s2330_s4 + $0x50] sm:$0xff] %v220_v1  ;;  %267 = vst [vmem:[%s2330_s4 + $0x58] sm:$0xff] %v222_v2  ;;  %v176_v6 = vld [vmem:[%s2334_s5 + $0x28] sm:$0xff]  ;;  %v208_v7 = vld [vmem:[%s2334_s5 + $0x50] sm:$0xff] }
  0x3b   : >> { %v252_v8 = vld [vmem:[%s2334_s5 + $0xa8] sm:$0xff]  ;;  %269 = vst [vmem:[%s2330_s4 + $0x60] sm:$0xff] %v224_v3  ;;  %271 = vst [vmem:[%s2330_s4 + $0x68] sm:$0xff] %v226_v4  ;;  %v254_v9 = vld [vmem:[%s2334_s5 + $0xb0] sm:$0xff]  ;;  %s3594_s8 = smov (%p295_p13, %s294_s8), 0 }
  0x3c   : >> { %273 = vst [vmem:[%s2330_s4 + $0x70] sm:$0xff] %v228_v5  ;;  %v256_v10 = vld [vmem:[%s2334_s5 + $0xb8] sm:$0xff]  ;;  %v258_v11 = vld [vmem:[%s2334_s5 + $0xc0] sm:$0xff]  ;;  %199 = vst [vmem:[%s2330_s4 + $0x18] sm:$0xff] %v176_v6  ;;  %s1787_s14 = sshll.u32 %s3594_s8, 7  ;;  %s3557_s6 = smov %s3594_s8 }
  0x3d   : >> { %231 = vst [vmem:[%s2330_s4 + $0x30] sm:$0xff] %v208_v7  ;;  %275 = vst [vmem:[%s2330_s4 + $0x78] sm:$0xff] %v252_v8  ;;  %v260_v12 = vld [vmem:[%s2334_s5 + $0xc8] sm:$0xff]  ;;  %v166_v13 = vld [vmem:[%s2334_s5] sm:$0xff]  ;;  %s300_s15 = scalar_lea.vmem %s2522_s28, %s1787_s14 [#allocation2]  }
  0x3e   : >> { %v168_v14 = vld [vmem:[%s2334_s5 + $0x8] sm:$0xff]  ;;  %277 = vst [vmem:[%s2330_s4 + $0x80] sm:$0xff] %v254_v9  ;;  %279 = vst [vmem:[%s2330_s4 + $0x88] sm:$0xff] %v256_v10  ;;  %v170_v15 = vld [vmem:[%s2334_s5 + $0x10] sm:$0xff] }
  0x3f   : >> { %281 = vst [vmem:[%s2330_s4 + $0x90] sm:$0xff] %v258_v11  ;;  %167 = vst [vmem:[%s2330_s4] sm:$0xff] %v166_v13  ;;  %v200_v16 = vld [vmem:[%s2334_s5 + $0x30] sm:$0xff]  ;;  %v202_v17 = vld [vmem:[%s2334_s5 + $0x38] sm:$0xff]  ;;  %162 = sbr.rel (!%p159_p0) target bundleno = 56 (0x38), region = 234 }
  0x40   : >> { %169 = vst [vmem:[%s2330_s4 + $0x8] sm:$0xff] %v168_v14  ;;  %283 = vst [vmem:[%s2330_s4 + $0x98] sm:$0xff] %v260_v12  ;;  %v232_v18 = vld [vmem:[%s2334_s5 + $0x58] sm:$0xff]  ;;  %v234_v19 = vld [vmem:[%s2334_s5 + $0x60] sm:$0xff] }
  0x41   : >> { %171 = vst [vmem:[%s2330_s4 + $0x10] sm:$0xff] %v170_v15  ;;  %201 = vst [vmem:[%s2330_s4 + $0x20] sm:$0xff] %v200_v16  ;;  %v284_v20 = vld [vmem:[%s2334_s5 + $0xd0] sm:$0xff]  ;;  %v286_v21 = vld [vmem:[%s2334_s5 + $0xd8] sm:$0xff] }
  0x42   : >> { %203 = vst [vmem:[%s2330_s4 + $0x28] sm:$0xff] %v202_v17  ;;  %233 = vst [vmem:[%s2330_s4 + $0x38] sm:$0xff] %v232_v18  ;;  %v288_v22 = vld [vmem:[%s2334_s5 + $0xe0] sm:$0xff]  ;;  %v290_v23 = vld [vmem:[%s2334_s5 + $0xe8] sm:$0xff] }
  0x43   : >> { %235 = vst [vmem:[%s2330_s4 + $0x40] sm:$0xff] %v234_v19  ;;  %285 = vst [vmem:[%s2330_s4 + $0xa0] sm:$0xff] %v284_v20  ;;  %v292_v24 = vld [vmem:[%s2334_s5 + $0xf0] sm:$0xff]  ;;  %s299_s5 = scalar_lea.vmem %s2518_s25, %s1787_s14  }
  0x44   : >> { %287 = vst [vmem:[%s2330_s4 + $0xa8] sm:$0xff] %v286_v21  ;;  %289 = vst [vmem:[%s2330_s4 + $0xb0] sm:$0xff] %v288_v22 }
  0x45   : >> { %291 = vst [vmem:[%s2330_s4 + $0xb8] sm:$0xff] %v290_v23  ;;  %293 = vst [vmem:[%s2330_s4 + $0xc0] sm:$0xff] %v292_v24  ;;  %s3556_s4 = smov %s300_s15 }
  0x46 PF: > { %s2624_s18 = sand.u32 15, %s153_s30   ;;  %s1843_s19 = sshll.u32 %s2533_s3, 11 }
  0x47   : > { %s305_s20 = sshra.s32 %s1843_s19, 4  ;;  %p1792_p1 = scmp.le.s32.totalorder %s2624_s18, 0 }
  0x48   : > { %s2628_s21 = scalar_lea.vmem %s2518_s25, %s305_s20   ;;  %s2631_s22 = scalar_lea.vmem %s2522_s28, %s305_s20 [#allocation2]  }
  0x49   : > { %1657 = sbr.rel (%p1792_p1) target bundleno = 90 (0x5a), region = 239  ;;  %s3558_s23 = smov (!%p1792_p1), %s2631_s22 }
  0x4a   : > { %s3559_s24 = smov (!%p1792_p1), %s2628_s21  ;;  %s2640_s26 = smov (!%p1792_p1), 0  }
  0x4b   : > { %s2356_s4 = smov (!%p1792_p1), 0  }
  0x50 LB: >> { %v321_v25 = vld [vmem:[%s2350_s24] sm:$0xff]  ;;  %v323_v26 = vld [vmem:[%s2350_s24 + $0x28] sm:$0xff]  ;;  %v325_v27 = vld [vmem:[%s2350_s24 + $0x50] sm:$0xff]  ;;  %s329_s30 = sadd.s32 1, %s2354_s26  ;;  %s315_s4 = sadd.s32 1, %s2358_s4   ;;  %s2358_s4 = sphi %s2356_s4, %s315_s4   ;;  %s2354_s26 = sphi %s2640_s26, %s3560_s26   ;;  %s2350_s24 = sphi %s3559_s24, %s334_s24   ;;  %s2346_s23 = sphi %s3558_s23, %s335_s23  }
  0x51   : >> { %322 = vst [vmem:[%s2346_s23] sm:$0xff] %v321_v25  ;;  %324 = vst [vmem:[%s2346_s23 + $0x18] sm:$0xff] %v323_v26  ;;  %v327_v28 = vld [vmem:[%s2350_s24 + $0x78] sm:$0xff]  ;;  %p330_p2 = scmp.ge.s32.totalorder %s329_s30, %s2624_s18  ;;  %p314_p3 = scmp.ge.s32.totalorder %s315_s4, %s2624_s18 }
  0x52   : >> { %326 = vst [vmem:[%s2346_s23 + $0x30] sm:$0xff] %v325_v27  ;;  %328 = vst [vmem:[%s2346_s23 + $0x48] sm:$0xff] %v327_v28 }
  0x53   : >> { %s3596_s30 = smov (%p330_p2, %s329_s30), 0  ;;  %317 = sbr.rel (!%p314_p3) target bundleno = 80 (0x50), region = 245 }
  0x54   : >> { %s1793_s3 = sshll.u32 %s3596_s30, 3  ;;  %s3560_s26 = smov %s3596_s30 }
  0x55   : >> { %s334_s24 = scalar_lea.vmem %s2628_s21, %s1793_s3   ;;  %s335_s23 = scalar_lea.vmem %s2631_s22, %s1793_s3 [#allocation2]  }
  0x5a PF: > { %338 = sbr.rel (%p149_p10) target bundleno = 144 (0x90), region = 61  ;;  %s340_s5 = ssub.s32 (!%p149_p10), %s2520_s27, %s2526_s29 }
  0x5b   : > { %s344_s6 = sshrl.u32 (!%p149_p10), %s2520_s27, 3  ;;  %s2661_s7 = scalar_lea.vmem (!%p149_p10), %s2518_s25, %s340_s5 }
  0x5c   : > { %s2664_s8 = scalar_lea.vmem (!%p149_p10), %s2522_s28, %s340_s5 [#allocation2]  ;;  %s2668_s14 = sshrl.u32 (!%p149_p10), %s344_s6, 4 }
  0x5d   : > { %p1795_p4 = scmp.le.s32.totalorder (!%p149_p10), %s2668_s14, 0 }
  0x61   : > { %1671 = sbr.rel (%p1795_p4) target bundleno = 118 (0x76), region = 250  ;;  %s3561_s15 = smov (!%p1795_p4), %s2522_s28 }
  0x62   : > { %s3562_s18 = smov (!%p1795_p4), %s2518_s25  ;;  %s2677_s19 = smov (!%p1795_p4), 0  }
  0x63   : > { %s2679_s20 = smov (!%p1795_p4), 0  }
  0x68 LB: >> { %v387_v29 = vld [vmem:[%s2366_s18 + $0x78] sm:$0xff]  ;;  %v411_v30 = vld [vmem:[%s2366_s18 + $0x80] sm:$0xff]  ;;  %v413_v31 = vld [vmem:[%s2366_s18 + $0x88] sm:$0xff]  ;;  %s485_s21 = sadd.s32 1, %s2370_s19  ;;  %s351_s20 = sadd.s32 1, %s2374_s20   ;;  %s2374_s20 = sphi %s2679_s20, %s351_s20   ;;  %s2370_s19 = sphi %s2677_s19, %s3564_s19   ;;  %s2366_s18 = sphi %s3562_s18, %s490_s18   ;;  %s2362_s15 = sphi %s3561_s15, %s3563_s15  }
  0x69   : >> { %v415_v32 = vld [vmem:[%s2366_s18 + $0x90] sm:$0xff]  ;;  %v417_v33 = vld [vmem:[%s2366_s18 + $0x98] sm:$0xff]  ;;  %v419_v34 = vld [vmem:[%s2366_s18 + $0xa0] sm:$0xff]  ;;  %454 = vst [vmem:[%s2362_s15 + $0x48] sm:$0xff] %v387_v29  ;;  %p486_p6 = scmp.ge.s32.totalorder %s485_s21, %s2668_s14  ;;  %p350_p7 = scmp.ge.s32.totalorder %s351_s20, %s2668_s14 }
  0x6a   : >> { %456 = vst [vmem:[%s2362_s15 + $0x50] sm:$0xff] %v411_v30  ;;  %458 = vst [vmem:[%s2362_s15 + $0x58] sm:$0xff] %v413_v31  ;;  %v367_v35 = vld [vmem:[%s2366_s18 + $0x28] sm:$0xff]  ;;  %v399_v36 = vld [vmem:[%s2366_s18 + $0x50] sm:$0xff] }
  0x6b   : >> { %v443_v37 = vld [vmem:[%s2366_s18 + $0xa8] sm:$0xff]  ;;  %460 = vst [vmem:[%s2362_s15 + $0x60] sm:$0xff] %v415_v32  ;;  %462 = vst [vmem:[%s2362_s15 + $0x68] sm:$0xff] %v417_v33  ;;  %v445_v38 = vld [vmem:[%s2366_s18 + $0xb0] sm:$0xff]  ;;  %s3598_s21 = smov (%p486_p6, %s485_s21), 0 }
  0x6c   : >> { %464 = vst [vmem:[%s2362_s15 + $0x70] sm:$0xff] %v419_v34  ;;  %v447_v39 = vld [vmem:[%s2366_s18 + $0xb8] sm:$0xff]  ;;  %v449_v40 = vld [vmem:[%s2366_s18 + $0xc0] sm:$0xff]  ;;  %390 = vst [vmem:[%s2362_s15 + $0x18] sm:$0xff] %v367_v35  ;;  %s1796_s22 = sshll.u32 %s3598_s21, 7  ;;  %s3564_s19 = smov %s3598_s21 }
  0x6d   : >> { %422 = vst [vmem:[%s2362_s15 + $0x30] sm:$0xff] %v399_v36  ;;  %466 = vst [vmem:[%s2362_s15 + $0x78] sm:$0xff] %v443_v37  ;;  %v451_v41 = vld [vmem:[%s2366_s18 + $0xc8] sm:$0xff]  ;;  %v357_v42 = vld [vmem:[%s2366_s18] sm:$0xff]  ;;  %s491_s23 = scalar_lea.vmem %s2522_s28, %s1796_s22 [#allocation2]  }
  0x6e   : >> { %v359_v43 = vld [vmem:[%s2366_s18 + $0x8] sm:$0xff]  ;;  %468 = vst [vmem:[%s2362_s15 + $0x80] sm:$0xff] %v445_v38  ;;  %470 = vst [vmem:[%s2362_s15 + $0x88] sm:$0xff] %v447_v39  ;;  %v361_v44 = vld [vmem:[%s2366_s18 + $0x10] sm:$0xff] }
  0x6f   : >> { %472 = vst [vmem:[%s2362_s15 + $0x90] sm:$0xff] %v449_v40  ;;  %358 = vst [vmem:[%s2362_s15] sm:$0xff] %v357_v42  ;;  %v391_v45 = vld [vmem:[%s2366_s18 + $0x30] sm:$0xff]  ;;  %v393_v46 = vld [vmem:[%s2366_s18 + $0x38] sm:$0xff]  ;;  %353 = sbr.rel (!%p350_p7) target bundleno = 104 (0x68), region = 256 }
  0x70   : >> { %360 = vst [vmem:[%s2362_s15 + $0x8] sm:$0xff] %v359_v43  ;;  %474 = vst [vmem:[%s2362_s15 + $0x98] sm:$0xff] %v451_v41  ;;  %v423_v47 = vld [vmem:[%s2366_s18 + $0x58] sm:$0xff]  ;;  %v425_v48 = vld [vmem:[%s2366_s18 + $0x60] sm:$0xff] }
  0x71   : >> { %362 = vst [vmem:[%s2362_s15 + $0x10] sm:$0xff] %v361_v44  ;;  %392 = vst [vmem:[%s2362_s15 + $0x20] sm:$0xff] %v391_v45  ;;  %v475_v49 = vld [vmem:[%s2366_s18 + $0xd0] sm:$0xff]  ;;  %v477_v50 = vld [vmem:[%s2366_s18 + $0xd8] sm:$0xff] }
  0x72   : >> { %394 = vst [vmem:[%s2362_s15 + $0x28] sm:$0xff] %v393_v46  ;;  %424 = vst [vmem:[%s2362_s15 + $0x38] sm:$0xff] %v423_v47  ;;  %v479_v51 = vld [vmem:[%s2366_s18 + $0xe0] sm:$0xff]  ;;  %v481_v52 = vld [vmem:[%s2366_s18 + $0xe8] sm:$0xff] }
  0x73   : >> { %426 = vst [vmem:[%s2362_s15 + $0x40] sm:$0xff] %v425_v48  ;;  %476 = vst [vmem:[%s2362_s15 + $0xa0] sm:$0xff] %v475_v49  ;;  %v483_v53 = vld [vmem:[%s2366_s18 + $0xf0] sm:$0xff]  ;;  %s490_s18 = scalar_lea.vmem %s2518_s25, %s1796_s22  }
  0x74   : >> { %478 = vst [vmem:[%s2362_s15 + $0xa8] sm:$0xff] %v477_v50  ;;  %480 = vst [vmem:[%s2362_s15 + $0xb0] sm:$0xff] %v479_v51 }
  0x75   : >> { %482 = vst [vmem:[%s2362_s15 + $0xb8] sm:$0xff] %v481_v52  ;;  %484 = vst [vmem:[%s2362_s15 + $0xc0] sm:$0xff] %v483_v53  ;;  %s3563_s15 = smov %s491_s23 }
  0x76 PF: > { %s2759_s24 = sand.u32 15, %s344_s6   ;;  %s1845_s26 = sshll.u32 %s2668_s14, 11 }
  0x77   : > { %s496_s4 = sshra.s32 %s1845_s26, 4  ;;  %p1801_p8 = scmp.le.s32.totalorder %s2759_s24, 0 }
  0x78   : > { %s2763_s30 = scalar_lea.vmem %s2518_s25, %s496_s4   ;;  %s2766_s3 = scalar_lea.vmem %s2522_s28, %s496_s4 [#allocation2]  }
  0x79   : > { %1685 = sbr.rel (%p1801_p8) target bundleno = 138 (0x8a), region = 261  ;;  %s3565_s5 = smov (!%p1801_p8), %s2766_s3 }
  0x7a   : > { %s3566_s15 = smov (!%p1801_p8), %s2763_s30  ;;  %s2775_s18 = smov (!%p1801_p8), 0  }
  0x7b   : > { %s2388_s19 = smov (!%p1801_p8), 0  }
  0x80 LB: >> { %v512_v54 = vld [vmem:[%s2382_s15] sm:$0xff]  ;;  %v514_v55 = vld [vmem:[%s2382_s15 + $0x28] sm:$0xff]  ;;  %v516_v56 = vld [vmem:[%s2382_s15 + $0x50] sm:$0xff]  ;;  %s520_s6 = sadd.s32 1, %s2386_s18  ;;  %s506_s19 = sadd.s32 1, %s2390_s19   ;;  %s2390_s19 = sphi %s2388_s19, %s506_s19   ;;  %s2386_s18 = sphi %s2775_s18, %s3567_s18   ;;  %s2382_s15 = sphi %s3566_s15, %s525_s15   ;;  %s2378_s5 = sphi %s3565_s5, %s526_s5  }
  0x81   : >> { %513 = vst [vmem:[%s2378_s5] sm:$0xff] %v512_v54  ;;  %515 = vst [vmem:[%s2378_s5 + $0x18] sm:$0xff] %v514_v55  ;;  %v518_v57 = vld [vmem:[%s2382_s15 + $0x78] sm:$0xff]  ;;  %p521_p9 = scmp.ge.s32.totalorder %s520_s6, %s2759_s24  ;;  %p505_p10 = scmp.ge.s32.totalorder %s506_s19, %s2759_s24 }
  0x82   : >> { %517 = vst [vmem:[%s2378_s5 + $0x30] sm:$0xff] %v516_v56  ;;  %519 = vst [vmem:[%s2378_s5 + $0x48] sm:$0xff] %v518_v57 }
  0x83   : >> { %s3600_s6 = smov (%p521_p9, %s520_s6), 0  ;;  %508 = sbr.rel (!%p505_p10) target bundleno = 128 (0x80), region = 267 }
  0x84   : >> { %s1802_s14 = sshll.u32 %s3600_s6, 3  ;;  %s3567_s18 = smov %s3600_s6 }
  0x85   : >> { %s525_s15 = scalar_lea.vmem %s2763_s30, %s1802_s14   ;;  %s526_s5 = scalar_lea.vmem %s2766_s3, %s1802_s14 [#allocation2]  }
  0x8a PF: > { %s2456_s20 = smov 0  }
  0x8b   : > { %s527_s21 = sshllo.u32 %s2456_s20, %s2526_s29 }
  0x8c   : > { %v536_v58 = vld [vmem:[%s2661_s7] sm:%s527_s21]  ;;  %v538_v59 = vld [vmem:[%s2661_s7 + $0x28] sm:%s527_s21] }
  0x8d   : > { %537 = vst [vmem:[%s2664_s8] sm:%s527_s21] %v536_v58  ;;  %539 = vst [vmem:[%s2664_s8 + $0x18] sm:%s527_s21] %v538_v59 }
  0x8e   : > { %v540_v60 = vld [vmem:[%s2661_s7 + $0x50] sm:%s527_s21]  ;;  %v542_v61 = vld [vmem:[%s2661_s7 + $0x78] sm:%s527_s21] }
  0x8f   : > { %541 = vst [vmem:[%s2664_s8 + $0x30] sm:%s527_s21] %v540_v60  ;;  %543 = vst [vmem:[%s2664_s8 + $0x48] sm:%s527_s21] %v542_v61 }
  0x90 PF: > { %p1804_p11 = scmp.ge.u32.totalorder %s2520_s27, 8 }
  0x91   : > { %s2457_s22 = smov (!%p1804_p11), 0  }
  0x92   : > { %130 = sbr.rel (%p1804_p11) target bundleno = 153 (0x99), region = 32  ;;  %s131_s29 = sshllo.u32 (!%p1804_p11), %s2457_s22, %s2520_s27 }
  0x93   : > { %v140_v62 = vld [vmem:[%s2518_s25] sm:%s131_s29] (!%p1804_p11)  ;;  %v142_v63 = vld [vmem:[%s2518_s25 + $0x28] sm:%s131_s29] (!%p1804_p11) }
  0x94   : > { %141 = vst [vmem:[%s2522_s28] sm:%s131_s29] (!%p1804_p11), %v140_v62  ;;  %143 = vst [vmem:[%s2522_s28 + $0x18] sm:%s131_s29] (!%p1804_p11), %v142_v63 }
  0x95   : > { %v144_v0 = vld [vmem:[%s2518_s25 + $0x50] sm:%s131_s29] (!%p1804_p11)  ;;  %v146_v1 = vld [vmem:[%s2518_s25 + $0x78] sm:%s131_s29] (!%p1804_p11) }
  0x96   : > { %145 = vst [vmem:[%s2522_s28 + $0x30] sm:%s131_s29] (!%p1804_p11), %v144_v0  ;;  %147 = vst [vmem:[%s2522_s28 + $0x48] sm:%s131_s29] (!%p1804_p11), %v146_v1 }
  0x99 PF: > { %p1805_p12 = scmp.ge.s32.totalorder %s2326_s11, 1  ;;  %p563_p13 = scmp.lt.s32.totalorder %s2326_s11, 3 }
  0x9b   : > { %p564_p0 = pnand %p1805_p12, %p563_p13 }
  0x9c   : > { %s570_s27 = sand.u32 (!%p564_p0), 1, %s2318_s9   ;;  %s2813_s7 = smul.u32 (!%p564_p0), 3, %s2492_s12  ;;  %v673_v2 = vlaneseq (!%p564_p0)  ;;  %v2458_v13 = vmov (!%p564_p0), 0.0   ;;  %vm922_vm1 = vcmask (!%p564_p0), 1044480   ;;  %vm1072_vm2 = vcmask (!%p564_p0), 1040384  }
  0x9d   : > { %567 = sbr.rel (%p564_p0) target bundleno = 377 (0x179), region = 90  ;;  %vm1079_vm3 = vcmask (!%p564_p0), 1042432  }
  0x9e   : > { %s2815_s25 = smul.u32 (!%p564_p0), 96, %s570_s27  ;;  %p609_p1 = scmp.lt.s32.totalorder (!%p564_p0), %s2813_s7, 4  ;;  %v2818_v3 = vshrl.u32 (!%p564_p0), %v673_v2, 7 }
  0xa0   : > { %s2822_s8 = scalar_lea.vmem (!%p564_p0), [#allocation2], %s2815_s25  ;;  %v679_v5 = vand.u32 (!%p564_p0), 1, %v2818_v3  ;;  %v2827_v7 = vsub.s32 (!%p564_p0), 2, %v2818_v3  ;;  %v2830_v8 = vsub.s32 (!%p564_p0), 3, %v2818_v3  ;;  %v2840_v11 = vsub.s32 (!%p564_p0), 0, %v2818_v3  ;;  %s3117_s26 = scalar_lea.vmem (!%p564_p0), [#allocation3], %s2815_s25  }
  0xa1   : > { %v623_v4 = vld [vmem:[%s2822_s8] sm:$0xff] (!%p564_p0)  ;;  %v2833_v9 = vld [vmem:[%s2822_s8 + $0x8] sm:$0xff] (!%p564_p0)  ;;  %v2852_v15 = vsub.s32 (!%p564_p0), 1, %v2818_v3  ;;  %v807_v16 = vsub.s32 (!%p564_p0), 6, %v2818_v3  ;;  %v834_v19 = vsub.s32 (!%p564_p0), 7, %v2818_v3  ;;  %v867_v20 = vsub.s32 (!%p564_p0), 4, %v2818_v3 }
  0xa2   : > { %v1807_v6 = vmul.f32 (!%p564_p0), -1.442695, %v623_v4  ;;  %vm2835_vm0 = vcmp.eq.s32.totalorder (!%p564_p0), %v679_v5, 0  ;;  %v1808_v12 = vmul.f32 (!%p564_p0), -1.442695, %v2833_v9  ;;  %v894_v23 = vsub.s32 (!%p564_p0), 5, %v2818_v3 }
  0xa3   : > { %v1813_v14 = vsel (!%p564_p0), %vm2835_vm0, 1.0, %v2458_v13  ;;  %v2866_v24 = vadd.s32 (!%p564_p0), 8, %v2818_v3  ;;  %v2891_v37 = vld [vmem:[%s2822_s8 + $0x10] sm:$0xff] (!%p564_p0) }
  0xa4   : > { %s610_s28 = scalar_select %p609_p1, %s2813_s7, 4  ;;  %2140 = vpow2.f32 %v1807_v6  ;;  %v690_v18 = vmul.f32 0.0, %v1813_v14  ;;  %v1809_v49 = vmul.f32 -1.442695, %v2891_v37 }
  0xa5   : > { %2142 = vpow2.f32 %v1808_v12  ;;  %s1112_s4 = ssub.s32 (%p2507_p5), 5, %s2813_s7  ;;  %s1847_s30 = smul.u32 (%p2507_p5), 24, %s2492_s12 }
  0xa6   : > { %s1806_s9 = sshll.u32 %s610_s28, 2  ;;  %v691_v25 = vadd.f32 0.1, %v690_v18  ;;  %v693_v26 = vadd.f32 0.2, %v690_v18  ;;  %v2868_v27 = vrot.slane %v690_v18, 7 }
  0xa7   : > { %s2846_s24 = scalar_lea.vmem %s3551_s1, %s1806_s9  ;;  %v2870_v28 = vrot.slane %v690_v18, 5  ;;  %v2888_v36 = vrot.slane %v690_v18, 3  ;;  %p1113_p2 = scmp.lt.s32.totalorder (%p2507_p5), %s1112_s4, 3 }
  0xa8   : > { %v2856_v17 = vld [vmem:[%s2846_s24] sm:$0xff]  ;;  %v2882_v33 = vrot.slane %v691_v25, 7  ;;  %v2884_v34 = vrot.slane %v693_v26, 5  ;;  %v2886_v35 = vrot.slane %v691_v25, 3  ;;  %v2957_v25 = vld [vmem:[%s2846_s24 + $0x8] sm:$0xf]  ;;  %s3227_s15 = scalar_lea.vmem (%p2507_p5), %s3552_s2, %s1847_s30  }
  0xa9   : > { %v804_v21 = vrot.slane %v2856_v17, %v2827_v7  ;;  %v831_v22 = vrot.slane %v2856_v17, %v2830_v8  ;;  %v864_v31 = vrot.slane %v2856_v17, %v2840_v11  ;;  %v891_v32 = vrot.slane %v2856_v17, %v2852_v15 }
  0xaa   : > { %v2905_v41 = vcombine.high %v2856_v17, %v2856_v17  ;;  %v697_v42 = vmul.f32 %v2882_v33, %v623_v4  ;;  %v715_v43 = vmul.f32 %v2884_v34, %v623_v4  ;;  %v732_v44 = vrot.slane %v2856_v17, 1 }
  0xab   : > { %v2873_v29 = vrot.slane %v804_v21, %v2827_v7  ;;  %v2876_v30 = vrot.slane %v831_v22, %v2830_v8  ;;  %v2898_v39 = vrot.slane %v864_v31, %v2840_v11  ;;  %v2901_v40 = vrot.slane %v891_v32, %v2852_v15 }
  0xac   : > { %v928_v45 = vmul.f32 %v2886_v35, %v623_v4  ;;  %v698_v47 = vmul.f32 %v2882_v33, %v2833_v9  ;;  %v716_v48 = vmul.f32 %v2884_v34, %v2833_v9  ;;  %v706_v50 = vadd.f32 %v2868_v27, %v697_v42 }
  0xad   : > { %v855_v38 = vsel %vm2835_vm0, %v2873_v29, %v2876_v30  ;;  %v723_v51 = vadd.f32 %v2870_v28, %v715_v43  ;;  %v915_v52 = vsel %vm2835_vm0, %v2898_v39, %v2901_v40  ;;  %v733_v57 = vrot.slane %v2905_v41, 1 }
  0xae   : > { %v2911_v46 = vrot.slane %v855_v38, 3  ;;  %v946_v53 = vadd.f32 %v2888_v36, %v928_v45  ;;  %v2141_v54 = vpop.eup %2140  ;;  %v707_v55 = vadd.f32 %v2868_v27, %v698_v47  ;;  %v724_v56 = vadd.f32 %v2870_v28, %v716_v48 }
  0xaf   : > { %v808_v58 = vrot.slane %v2856_v17, %v807_v16  ;;  %v2143_v59 = vpop.eup %2142  ;;  %v655_v60 = vadd.f32 1.0, %v2141_v54  ;;  %v738_v61 = vmul.f32 %v732_v44, %v706_v50  ;;  %v2932_v62 = vrot.slane %v2856_v17, 7 }
  0xb0   : > { %v756_v63 = vmul.f32 1.442695, %v723_v51  ;;  %v979_v0 = vmul.f32 %v2911_v46, %v946_v53  ;;  %v2935_v1 = vrot.slane %v915_v52, 3  ;;  %v2938_v2 = vrot.slane %v2905_v41, 7 }
  0xb1   : > { %v758_v3 = vmul.f32 1.442695, %v724_v56  ;;  %2144 = vrcp.f32 %v655_v60  ;;  %v656_v4 = vadd.f32 1.0, %v2143_v59  ;;  %v2941_v5 = vrot.slane %v808_v58, %v2827_v7 }
  0xb2   : > { %v835_v6 = vrot.slane %v2856_v17, %v834_v19  ;;  %2146 = vpow2.f32 %v756_v63  ;;  %v739_v12 = vmul.f32 %v733_v57, %v707_v55  ;;  %v868_v14 = vrot.slane %v2856_v17, %v867_v20 }
  0xb3   : > { %v895_v16 = vrot.slane %v2856_v17, %v894_v23  ;;  %v2949_v18 = vadd.f32 %v2932_v62, %v738_v61  ;;  %v929_v22 = vmul.f32 %v2886_v35, %v2833_v9  ;;  %v699_v19 = vmul.f32 %v2882_v33, %v2891_v37  ;;  %v3014_v61 = vld [vmem:[%s2822_s8 + $0x30] sm:$0xff] }
  0xb4   : > { %v2952_v21 = vrot.slane %v835_v6, %v2830_v8  ;;  %2148 = vpow2.f32 %v758_v3  ;;  %v2962_v26 = vrot.slane %v868_v14, %v2840_v11  ;;  %v717_v23 = vmul.f32 %v2884_v34, %v2891_v37 }
  0xb5   : > { %v2965_v20 = vrot.slane %v895_v16, %v2852_v15  ;;  %v947_v31 = vadd.f32 %v2888_v36, %v929_v22  ;;  %2150 = vpow2.f32 %v1809_v49  ;;  %v708_v32 = vadd.f32 %v2868_v27, %v699_v19 }
  0xb6   : > { %v856_v9 = vsel %vm2835_vm0, %v2941_v5, %v2952_v21  ;;  %v725_v43 = vadd.f32 %v2870_v28, %v717_v23  ;;  %v734_v45 = vrot.slane %v2957_v25, 1  ;;  %2152 = vrcp.f32 %v656_v4 }
  0xb7   : > { %v916_v38 = vsel %vm2835_vm0, %v2962_v26, %v2965_v20  ;;  %v2979_v42 = vrot.slane %v856_v9, 3  ;;  %v812_v48 = vrot.slane %v2957_v25, %v2827_v7  ;;  %v839_v49 = vrot.slane %v2957_v25, %v2830_v8 }
  0xb8   : > { %v2983_v47 = vrot.slane %v916_v38, 3  ;;  %v740_v51 = vmul.f32 %v734_v45, %v708_v32  ;;  %v760_v52 = vmul.f32 1.442695, %v725_v43  ;;  %v872_v53 = vrot.slane %v2957_v25, %v2840_v11 }
  0xb9   : > { %v980_v50 = vmul.f32 %v2979_v42, %v947_v31  ;;  %v2995_v54 = vrot.slane %v812_v48, %v2827_v7  ;;  %v2998_v55 = vrot.slane %v839_v49, %v2830_v8  ;;  %v899_v56 = vrot.slane %v2957_v25, %v2852_v15 }
  0xba   : > { %v930_v58 = vmul.f32 %v2886_v35, %v2891_v37  ;;  %v3005_v59 = vadd.f32 %v2935_v1, %v979_v0  ;;  %v3008_v60 = vrot.slane %v2957_v25, 7  ;;  %2154 = vpow2.f32 %v760_v52 }
  0xbb   : > { %v3011_v7 = vrot.slane %v872_v53, %v2840_v11  ;;  %v2145_v8 = vpop.eup %2144  ;;  %v857_v63 = vsel %vm2835_vm0, %v2995_v54, %v2998_v55  ;;  %v3021_v37 = vrot.slane %v899_v56, %v2852_v15  ;;  %v785_v3 = vand.u32 1, %v2866_v24 }
  0xbc   : > { %v948_v0 = vadd.f32 %v2888_v36, %v930_v58  ;;  %v2147_v4 = vpop.eup %2146  ;;  %v751_v11 = vadd.f32 %v2938_v2, %v739_v12  ;;  %v3027_v6 = vadd.f32 %v2983_v47, %v980_v50  ;;  %v3030_v14 = vadd.f32 %v3008_v60, %v740_v51 }
  0xbd   : > { %v3032_v16 = vrot.slane %v857_v63, 3  ;;  %v768_v22 = vmul.f32 0.5, %v2147_v4  ;;  %v917_v15 = vsel %vm2835_vm0, %v3011_v7, %v3021_v37  ;;  %vm3038_vm4 = vcmp.eq.s32.totalorder %v785_v3, 0 }
  0xbe   : > { %v3043_v12 = vmul.f32 -1.442695, %v3014_v61  ;;  %v2149_v19 = vpop.eup %2148  ;;  %v1814_v9 = vsel %vm3038_vm4, 1.0, %v2458_v13  ;;  %v858_v10 = vsel %vm3038_vm4, %v2873_v29, %v2876_v30  ;;  %v3057_v31 = vmul.f32 %v2884_v34, %v3014_v61 }
  0xbf   : > { %v3046_v23 = vmul.f32 %v3032_v16, %v948_v0  ;;  %v2151_v32 = vpop.eup %2150  ;;  %v774_v38 = vmul.f32 %v768_v22, %v2932_v62  ;;  %v769_v43 = vmul.f32 0.5, %v2149_v19  ;;  %v796_v48 = vmul.f32 0.0, %v1814_v9  ;;  %v626_v19 = vld [vmem:[%s2822_s8 + $0x18] sm:$0x7f] }
  0xc0   : > { %v918_v49 = vsel %vm3038_vm4, %v2898_v39, %v2901_v40  ;;  %v657_v13 = vadd.f32 1.0, %v2151_v32  ;;  %v3064_v50 = vrot.slane %v917_v15, 3  ;;  %v967_v51 = vrot.slane %v858_v10, 3  ;;  %v2153_v30 = vpop.eup %2152 }
  0xc1   : > { %v1000_v29 = vrot.slane %v918_v49, 3  ;;  %v1030_v52 = vrot.slane %v774_v38, 2  ;;  %v775_v53 = vmul.f32 %v769_v43, %v2938_v2  ;;  %v797_v56 = vadd.f32 0.1, %v796_v48 }
  0xc2   : > { %v942_v58 = vrot.slane %v796_v48, 3  ;;  %2156 = vrcp.f32 %v657_v13  ;;  %v3069_v63 = vsel %vm922_vm1, %v2911_v46, %v967_v51  ;;  %v859_v40 = vsel %vm3038_vm4, %v2941_v5, %v2952_v21  ;;  %v627_v48 = vld [vmem:[%s2822_s8 + $0x20] sm:$0x7f]  ;;  %v628_v51 = vld [vmem:[%s2822_s8 + $0x28] sm:$0x7f] }
  0xc3   : > { %v3073_v39 = vsel %vm922_vm1, %v2935_v1, %v1000_v29  ;;  %v1042_v0 = vsub.f32 %v2949_v18, %v1030_v52  ;;  %v1048_v3 = vadd.f32 %v1030_v52, %v2949_v18  ;;  %v1031_v4 = vrot.slane %v775_v53, 2 }
  0xc4   : > { %v924_v22 = vrot.slane %v797_v56, 3  ;;  %v2155_v15 = vpop.eup %2154  ;;  %v3084_v9 = vsel %vm922_vm1, %v2888_v36, %v942_v58  ;;  %v919_v10 = vsel %vm3038_vm4, %v2962_v26, %v2965_v20  ;;  %v969_v32 = vrot.slane %v859_v40, 3 }
  0xc5   : > { %v860_v5 = vsel %vm3038_vm4, %v2995_v54, %v2998_v55  ;;  %v1060_v18 = vrot.slane %v1048_v3, 6  ;;  %v1073_v21 = vsel %vm1072_vm2, %v2145_v8, %v1042_v0  ;;  %v1043_v38 = vsub.f32 %v751_v11, %v1031_v4 }
  0xc6   : > { %v1049_v43 = vadd.f32 %v1031_v4, %v751_v11  ;;  %v770_v49 = vmul.f32 0.5, %v2155_v15  ;;  %v3098_v13 = vsel %vm922_vm1, %v2886_v35, %v924_v22  ;;  %v3102_v26 = vsel %vm922_vm1, %v2979_v42, %v969_v32 }
  0xc7   : > { %v1002_v20 = vrot.slane %v919_v10, 3  ;;  %v1080_v54 = vsel %vm1079_vm3, %v1073_v21, %v1060_v18  ;;  %v1074_v8 = vsel %vm1072_vm2, %v2153_v30, %v1043_v38  ;;  %v931_v29 = vmul.f32 %v3098_v13, %v626_v19 }
  0xc8   : > { %v1061_v55 = vrot.slane %v1049_v43, 6  ;;  %v1086_v11 = vsel %vm922_vm1, %v1080_v54, %v3005_v59  ;;  %v776_v52 = vmul.f32 %v770_v49, %v3008_v60  ;;  %v932_v53 = vmul.f32 %v3098_v13, %v627_v48 }
  0xc9   : > { %v3114_v56 = vsel %vm922_vm1, %v2983_v47, %v1002_v20  ;;  %1092 = vst [vmem:[%s3117_s26] sm:$0xff] %v1086_v11  ;;  %v949_v58 = vadd.f32 %v3084_v9, %v931_v29  ;;  %v920_v59 = vsel %vm3038_vm4, %v3011_v7, %v3021_v37  ;;  %v933_v40 = vmul.f32 %v3098_v13, %v628_v51  ;;  %v632_v11 = vld [vmem:[%s2822_s8 + $0x48] sm:$0x7f] }
  0xca   : > { %v1081_v30 = vsel %vm1079_vm3, %v1074_v8, %v1061_v55  ;;  %v1032_v3 = vrot.slane %v776_v52, 2  ;;  %v950_v4 = vadd.f32 %v3084_v9, %v932_v53  ;;  %v971_v22 = vrot.slane %v860_v5, 3  ;;  %v630_v5 = vld [vmem:[%s2822_s8 + $0x38] sm:$0xff]  ;;  %v631_v8 = vld [vmem:[%s2822_s8 + $0x40] sm:$0xff] }
  0xcb   : > { %v1087_v0 = vsel %vm922_vm1, %v1081_v30, %v3027_v6  ;;  %v982_v15 = vmul.f32 %v3069_v63, %v949_v58  ;;  %v951_v19 = vadd.f32 %v3084_v9, %v933_v40  ;;  %v1004_v10 = vrot.slane %v920_v59, 3 }
  0xcc   : > { %1093 = vst [vmem:[%s3117_s26 + $0x8] sm:$0xff] %v1087_v0  ;;  %2158 = vpow2.f32 %v3043_v12  ;;  %v2157_v7 = vpop.eup %2156  ;;  %v1044_v37 = vsub.f32 %v3030_v14, %v1032_v3  ;;  %v1050_v24 = vadd.f32 %v1032_v3, %v3030_v14  ;;  %v983_v6 = vmul.f32 %v3102_v26, %v950_v4  ;;  %v633_v4 = vld [vmem:[%s2822_s8 + $0x50] sm:$0x7f] }
  0xcd   : > { %v972_v32 = vsel %vm922_vm1, %v3032_v16, %v971_v22  ;;  %v1014_v18 = vadd.f32 %v3064_v50, %v3046_v23  ;;  %v1015_v21 = vadd.f32 %v3073_v39, %v982_v15  ;;  %v1005_v38 = vsel %vm922_vm1, %v3064_v50, %v1004_v10  ;;  %v634_v22 = vld [vmem:[%s2822_s8 + $0x58] sm:$0x7f] }
  0xce   : > { %v984_v12 = vmul.f32 %v972_v32, %v951_v19  ;;  %v1062_v14 = vrot.slane %v1050_v24, 6  ;;  %v1075_v43 = vsel %vm1072_vm2, %v2157_v7, %v1044_v37  ;;  %v1016_v48 = vadd.f32 %v3114_v56, %v983_v6 }
  0xcf   : > { %v726_v49 = vadd.f32 %v2870_v28, %v3057_v31  ;;  %1095 = vst [vmem:[%s3117_s26 + $0x18] sm:$0x7f] %v1015_v21  ;;  %v1811_v23 = vmul.f32 -1.442695, %v630_v5  ;;  %v719_v55 = vmul.f32 %v2884_v34, %v630_v5  ;;  %v700_v52 = vmul.f32 %v2882_v33, %v3014_v61 }
  0xd0   : > { %v1017_v20 = vadd.f32 %v1005_v38, %v984_v12  ;;  %v1082_v51 = vsel %vm1079_vm3, %v1075_v43, %v1062_v14  ;;  %1096 = vst [vmem:[%s3117_s26 + $0x20] sm:$0x7f] %v1016_v48  ;;  %v1812_v53 = vmul.f32 -1.442695, %v631_v8  ;;  %v720_v30 = vmul.f32 %v2884_v34, %v631_v8 }
  0xd1   : > { %v762_v54 = vmul.f32 1.442695, %v726_v49  ;;  %v1088_v29 = vsel %vm922_vm1, %v1082_v51, %v1014_v18  ;;  %2160 = vpow2.f32 %v1811_v23  ;;  %v727_v31 = vadd.f32 %v2870_v28, %v719_v55 }
  0xd2   : > { %1097 = vst [vmem:[%s3117_s26 + $0x28] sm:$0x7f] %v1017_v20  ;;  %1094 = vst [vmem:[%s3117_s26 + $0x10] sm:$0xff] %v1088_v29  ;;  %v701_v40 = vmul.f32 %v2882_v33, %v630_v5  ;;  %v728_v0 = vadd.f32 %v2870_v28, %v720_v30  ;;  %v937_v3 = vmul.f32 %v3098_v13, %v632_v11 }
  0xd3   : > { %2162 = vpow2.f32 %v762_v54  ;;  %v764_v58 = vmul.f32 1.442695, %v727_v31  ;;  %v709_v19 = vadd.f32 %v2868_v27, %v700_v52  ;;  %v934_v10 = vmul.f32 %v2886_v35, %v3014_v61 }
  0xd4   : > { %2164 = vpow2.f32 %v1812_v53  ;;  %v766_v7 = vmul.f32 1.442695, %v728_v0  ;;  %v955_v34 = vadd.f32 %v3084_v9, %v937_v3  ;;  %v938_v37 = vmul.f32 %v3098_v13, %v633_v4 }
  0xd5   : > { %2166 = vpow2.f32 %v764_v58  ;;  %v939_v24 = vmul.f32 %v3098_v13, %v634_v22  ;;  %v710_v28 = vadd.f32 %v2868_v27, %v701_v40  ;;  %v702_v18 = vmul.f32 %v2882_v33, %v631_v8 }
  0xd6   : > { %v2159_v59 = vpop.eup %2158  ;;  %v988_v6 = vmul.f32 %v3069_v63, %v955_v34  ;;  %v956_v21 = vadd.f32 %v3084_v9, %v938_v37  ;;  %v741_v14 = vmul.f32 %v732_v44, %v709_v19  ;;  %v952_v43 = vadd.f32 %v2888_v36, %v934_v10 }
  0xd7   : > { %v658_v15 = vadd.f32 1.0, %v2159_v59  ;;  %v957_v61 = vadd.f32 %v3084_v9, %v939_v24  ;;  %v935_v20 = vmul.f32 %v2886_v35, %v630_v5  ;;  %v742_v9 = vmul.f32 %v733_v57, %v710_v28 }
  0xd8   : > { %v1021_v13 = vadd.f32 %v3073_v39, %v988_v6  ;;  %v989_v63 = vmul.f32 %v3102_v26, %v956_v21  ;;  %v711_v17 = vadd.f32 %v2868_v27, %v702_v18  ;;  %v753_v54 = vadd.f32 %v2932_v62, %v741_v14 }
  0xd9   : > { %2168 = vrcp.f32 %v658_v15  ;;  %v990_v23 = vmul.f32 %v972_v32, %v957_v61  ;;  %v936_v26 = vmul.f32 %v2886_v35, %v631_v8  ;;  %v985_v55 = vmul.f32 %v2911_v46, %v952_v43 }
  0xda   : > { %2170 = vpow2.f32 %v766_v7  ;;  %1101 = vst [vmem:[%s3117_s26 + $0x48] sm:$0x7f] %v1021_v13  ;;  %v1022_v44 = vadd.f32 %v3114_v56, %v989_v63  ;;  %v953_v41 = vadd.f32 %v2888_v36, %v935_v20  ;;  %v754_v56 = vadd.f32 %v2938_v2, %v742_v9 }
  0xdb   : > { %v2161_v12 = vpop.eup %2160  ;;  %v1023_v39 = vadd.f32 %v1005_v38, %v990_v23  ;;  %v743_v38 = vmul.f32 %v734_v45, %v711_v17  ;;  %v954_v46 = vadd.f32 %v2888_v36, %v936_v26  ;;  %v1018_v52 = vadd.f32 %v2935_v1, %v985_v55 }
  0xdc   : > { %v659_v49 = vadd.f32 1.0, %v2161_v12  ;;  %1102 = vst [vmem:[%s3117_s26 + $0x50] sm:$0x7f] %v1022_v44  ;;  %v986_v53 = vmul.f32 %v2979_v42, %v953_v41 }
  0xdd   : > { %v2163_v48 = vpop.eup %2162  ;;  %1103 = vst [vmem:[%s3117_s26 + $0x58] sm:$0x7f] %v1023_v39  ;;  %v755_v25 = vadd.f32 %v3008_v60, %v743_v38  ;;  %v987_v36 = vmul.f32 %v3032_v16, %v954_v46 }
  0xde   : > { %v771_v33 = vmul.f32 0.5, %v2163_v48  ;;  %2172 = vrcp.f32 %v659_v49  ;;  %v2165_v51 = vpop.eup %2164  ;;  %v1019_v42 = vadd.f32 %v2983_v47, %v986_v53 }
  0xdf   : > { %v2167_v32 = vpop.eup %2166  ;;  %v660_v57 = vadd.f32 1.0, %v2165_v51  ;;  %v1020_v34 = vadd.f32 %v3064_v50, %v987_v36 }
  0xe0   : > { %v777_v5 = vmul.f32 %v771_v33, %v2932_v62  ;;  %v772_v27 = vmul.f32 0.5, %v2167_v32 }
  0xe1   : > { %2174 = vrcp.f32 %v660_v57 }
  0xe2   : > { %v1033_v29 = vrot.slane %v777_v5, 2  ;;  %v778_v8 = vmul.f32 %v772_v27, %v2938_v2 }
  0xe3   : > { %v2169_v31 = vpop.eup %2168 }
  0xe4   : > { %v2171_v62 = vpop.eup %2170  ;;  %v1045_v11 = vsub.f32 %v753_v54, %v1033_v29  ;;  %v1051_v35 = vadd.f32 %v1033_v29, %v753_v54  ;;  %v1034_v40 = vrot.slane %v778_v8, 2 }
  0xe5   : > { %v773_v30 = vmul.f32 0.5, %v2171_v62 }
  0xe6   : > { %v1063_v58 = vrot.slane %v1051_v35, 6  ;;  %v1076_v59 = vsel %vm1072_vm2, %v2169_v31, %v1045_v11  ;;  %v1046_v3 = vsub.f32 %v754_v56, %v1034_v40  ;;  %v1052_v2 = vadd.f32 %v1034_v40, %v754_v56 }
  0xe7   : > { %v779_v45 = vmul.f32 %v773_v30, %v3008_v60 }
  0xe8   : > { %v1083_v0 = vsel %vm1079_vm3, %v1076_v59, %v1063_v58  ;;  %v2173_v1 = vpop.eup %2172  ;;  %v1064_v15 = vrot.slane %v1052_v2, 6 }
  0xe9   : > { %v1089_v4 = vsel %vm922_vm1, %v1083_v0, %v1018_v52  ;;  %v1035_v22 = vrot.slane %v779_v45, 2  ;;  %v1077_v19 = vsel %vm1072_vm2, %v2173_v1, %v1046_v3 }
  0xea   : > { %1098 = vst [vmem:[%s3117_s26 + $0x30] sm:$0xff] %v1089_v4  ;;  %v1084_v7 = vsel %vm1079_vm3, %v1077_v19, %v1064_v15 }
  0xeb   : > { %v1047_v10 = vsub.f32 %v755_v25, %v1035_v22  ;;  %v1053_v60 = vadd.f32 %v1035_v22, %v755_v25  ;;  %v2175_v37 = vpop.eup %2174  ;;  %v1090_v16 = vsel %vm922_vm1, %v1084_v7, %v1019_v42  ;;  %1110 = sbr.rel (!%p2507_p5) target bundleno = 377 (0x179), region = 98 }
  0xec   : > { %1099 = vst [vmem:[%s3117_s26 + $0x38] sm:$0xff] %v1090_v16 }
  0xed   : > { %v1065_v24 = vrot.slane %v1053_v60, 6  ;;  %v1078_v28 = vsel %vm1072_vm2, %v2175_v37, %v1047_v10 }
  0xef   : > { %v1085_v47 = vsel %vm1079_vm3, %v1078_v28, %v1065_v24 }
  0xf0   : > { %v1091_v6 = vsel %vm922_vm1, %v1085_v47, %v1020_v34 }
  0xf1   : > { %1100 = vst [vmem:[%s3117_s26 + $0x40] sm:$0xff] %v1091_v6 }
  0xf2   : > { %s3602_s4 = smov (!%p1113_p2, %s1112_s4), 3 }
  0xf3   : > { %s1815_s18 = sshll.u32 %s3602_s4, 9  ;;  %s3229_s19 = sshll.u32 %s3602_s4, 3 }
  0xf4   : > { %p1819_p3 = scmp.eq.s32.totalorder %s1815_s18, 0 }
  0xf5   : > { %p1123_p4 = scmp.lt.u32.totalorder (!%p1819_p3), %s3229_s19, 8 }
  0xf6   : > { %1122 = sbr.rel (%p1819_p3) target bundleno = 377 (0x179), region = 102 }
  0xfd   : > { %1126 = sbr.rel (%p1123_p4) target bundleno = 368 (0x170), region = 106  ;;  %s3233_s17 = sand.u32 (!%p1123_p4), 7, %s3229_s19  }
  0xfe   : > { %p1148_p5 = scmp.eq.s32.totalorder (!%p1123_p4), %s3233_s17, 0  ;;  %p1820_p6 = scmp.ne.s32.totalorder (!%p1123_p4), %s3233_s17, 0 }
 0x104   : > { %1151 = sbr.rel (%p1820_p6) target bundleno = 311 (0x137), region = 121  ;;  %s1152_s12 = sshrl.u32 (!%p1820_p6), %s3229_s19, 3 }
 0x105   : > { %s3240_s6 = sshrl.u32 (!%p1820_p6), %s1152_s12, 4 }
 0x106   : > { %p1821_p7 = scmp.le.s32.totalorder (!%p1820_p6), %s3240_s6, 0 }
 0x10b   : > { %1699 = sbr.rel (%p1821_p7) target bundleno = 291 (0x123), region = 272  ;;  %s3572_s14 = smov (!%p1821_p7), %s3227_s15 }
 0x10c   : > { %s3573_s20 = smov (!%p1821_p7), %s3117_s26  ;;  %s3249_s21 = smov (!%p1821_p7), 0  }
 0x10d   : > { %s3251_s22 = smov (!%p1821_p7), 0  }
 0x112 LB: >> { %v1165_v50 = vld [vmem:[%s2398_s20] sm:$0xff]  ;;  %v1167_v18 = vld [vmem:[%s2398_s20 + $0x8] sm:$0xff]  ;;  %v1169_v21 = vld [vmem:[%s2398_s20 + $0x10] sm:$0xff]  ;;  %s1293_s29 = sadd.s32 1, %s2402_s21  ;;  %s1159_s22 = sadd.s32 1, %s2406_s22   ;;  %s2406_s22 = sphi %s3251_s22, %s1159_s22   ;;  %s2402_s21 = sphi %s3249_s21, %s3576_s21   ;;  %s2398_s20 = sphi %s3573_s20, %s1298_s20   ;;  %s2394_s14 = sphi %s3572_s14, %s3575_s14  }
 0x113   : >> { %1166 = vst [vmem:[%s2394_s14] sm:$0xff] %v1165_v50  ;;  %1168 = vst [vmem:[%s2394_s14 + $0x8] sm:$0xff] %v1167_v18  ;;  %v1171_v61 = vld [vmem:[%s2398_s20 + $0x18] sm:$0xff]  ;;  %v1173_v12 = vld [vmem:[%s2398_s20 + $0x20] sm:$0xff]  ;;  %p3292_p8 = scmp.ge.s32.totalorder %s1293_s29, %s3240_s6  ;;  %p1158_p9 = scmp.ge.s32.totalorder %s1159_s22, %s3240_s6 }
 0x114   : >> { %1170 = vst [vmem:[%s2394_s14 + $0x10] sm:$0xff] %v1169_v21  ;;  %v1201_v14 = vld [vmem:[%s2398_s20 + $0x28] sm:$0xff]  ;;  %1172 = vst [vmem:[%s2394_s14 + $0x18] sm:$0xff] %v1171_v61  ;;  %v1203_v43 = vld [vmem:[%s2398_s20 + $0x30] sm:$0xff] }
 0x115   : >> { %1174 = vst [vmem:[%s2394_s14 + $0x20] sm:$0xff] %v1173_v12  ;;  %1198 = vst [vmem:[%s2394_s14 + $0x28] sm:$0xff] %v1171_v61  ;;  %v1205_v13 = vld [vmem:[%s2398_s20 + $0x38] sm:$0xff]  ;;  %v1233_v48 = vld [vmem:[%s2398_s20 + $0x40] sm:$0xff]  ;;  %s3604_s29 = smov (%p3292_p8, %s1293_s29), 0 }
 0x116   : >> { %1200 = vst [vmem:[%s2394_s14 + $0x30] sm:$0xff] %v1173_v12  ;;  %1202 = vst [vmem:[%s2394_s14 + $0x38] sm:$0xff] %v1201_v14  ;;  %v1235_v49 = vld [vmem:[%s2398_s20 + $0x48] sm:$0xff]  ;;  %v1237_v20 = vld [vmem:[%s2398_s20 + $0x50] sm:$0xff]  ;;  %s1822_s7 = sshll.u32 %s3604_s29, 7  ;;  %s3576_s21 = smov %s3604_s29 }
 0x117   : >> { %1204 = vst [vmem:[%s2394_s14 + $0x40] sm:$0xff] %v1203_v43  ;;  %1206 = vst [vmem:[%s2394_s14 + $0x48] sm:$0xff] %v1205_v13  ;;  %v1265_v63 = vld [vmem:[%s2398_s20 + $0x58] sm:$0xff]  ;;  %v1267_v23 = vld [vmem:[%s2398_s20 + $0x60] sm:$0xff]  ;;  %s1299_s25 = scalar_lea.vmem %s3227_s15, %s1822_s7  }
 0x118   : >> { %1230 = vst [vmem:[%s2394_s14 + $0x50] sm:$0xff] %v1203_v43  ;;  %1232 = vst [vmem:[%s2394_s14 + $0x58] sm:$0xff] %v1205_v13  ;;  %v1269_v33 = vld [vmem:[%s2398_s20 + $0x68] sm:$0xff]  ;;  %v1271_v9 = vld [vmem:[%s2398_s20 + $0x70] sm:$0xff] }
 0x119   : >> { %1234 = vst [vmem:[%s2394_s14 + $0x60] sm:$0xff] %v1233_v48  ;;  %1236 = vst [vmem:[%s2394_s14 + $0x68] sm:$0xff] %v1235_v49  ;;  %v1273_v17 = vld [vmem:[%s2398_s20 + $0x78] sm:$0xff]  ;;  %v1275_v44 = vld [vmem:[%s2398_s20 + $0x80] sm:$0xff] }
 0x11a   : >> { %1238 = vst [vmem:[%s2394_s14 + $0x70] sm:$0xff] %v1237_v20  ;;  %1262 = vst [vmem:[%s2394_s14 + $0x78] sm:$0xff] %v1235_v49  ;;  %v1277_v39 = vld [vmem:[%s2398_s20 + $0x88] sm:$0xff]  ;;  %v1279_v51 = vld [vmem:[%s2398_s20 + $0x90] sm:$0xff] }
 0x11b   : >> { %1264 = vst [vmem:[%s2394_s14 + $0x80] sm:$0xff] %v1237_v20  ;;  %1266 = vst [vmem:[%s2394_s14 + $0x88] sm:$0xff] %v1265_v63  ;;  %v1281_v54 = vld [vmem:[%s2398_s20 + $0x98] sm:$0xff]  ;;  %v1283_v5 = vld [vmem:[%s2398_s20 + $0xa0] sm:$0xff] }
 0x11c   : >> { %1268 = vst [vmem:[%s2394_s14 + $0x90] sm:$0xff] %v1267_v23  ;;  %1270 = vst [vmem:[%s2394_s14 + $0x98] sm:$0xff] %v1269_v33  ;;  %v1285_v26 = vld [vmem:[%s2398_s20 + $0xa8] sm:$0xff]  ;;  %v1287_v32 = vld [vmem:[%s2398_s20 + $0xb0] sm:$0xff]  ;;  %1161 = sbr.rel (!%p1158_p9) target bundleno = 274 (0x112), region = 278 }
 0x11d   : >> { %1272 = vst [vmem:[%s2394_s14 + $0xa0] sm:$0xff] %v1271_v9  ;;  %1274 = vst [vmem:[%s2394_s14 + $0xa8] sm:$0xff] %v1273_v17  ;;  %v1289_v55 = vld [vmem:[%s2398_s20 + $0xb8] sm:$0xff]  ;;  %v1291_v41 = vld [vmem:[%s2398_s20 + $0xc0] sm:$0xff]  ;;  %s1298_s20 = scalar_lea.vmem %s3117_s26, %s1822_s7 [#allocation3]  }
 0x11e   : >> { %1276 = vst [vmem:[%s2394_s14 + $0xb0] sm:$0xff] %v1275_v44  ;;  %1278 = vst [vmem:[%s2394_s14 + $0xb8] sm:$0xff] %v1277_v39 }
 0x11f   : >> { %1280 = vst [vmem:[%s2394_s14 + $0xc0] sm:$0xff] %v1279_v51  ;;  %1282 = vst [vmem:[%s2394_s14 + $0xc8] sm:$0xff] %v1281_v54 }
 0x120   : >> { %1284 = vst [vmem:[%s2394_s14 + $0xd0] sm:$0xff] %v1283_v5  ;;  %1286 = vst [vmem:[%s2394_s14 + $0xd8] sm:$0xff] %v1285_v26 }
 0x121   : >> { %1288 = vst [vmem:[%s2394_s14 + $0xe0] sm:$0xff] %v1287_v32  ;;  %1290 = vst [vmem:[%s2394_s14 + $0xe8] sm:$0xff] %v1289_v55 }
 0x122   : >> { %1292 = vst [vmem:[%s2394_s14 + $0xf0] sm:$0xff] %v1291_v41  ;;  %s3575_s14 = smov %s1299_s25 }
 0x123 PF: > { %s3343_s28 = sand.u32 15, %s1152_s12   ;;  %s1848_s8 = sshll.u32 %s3240_s6, 11 }
 0x124   : > { %s1304_s9 = sshra.s32 %s1848_s8, 4  ;;  %p1827_p10 = scmp.le.s32.totalorder %s3343_s28, 0 }
 0x125   : > { %s3347_s11 = scalar_lea.vmem %s3117_s26, %s1304_s9 [#allocation3]   ;;  %s3350_s23 = scalar_lea.vmem %s3227_s15, %s1304_s9  }
 0x126   : > { %1713 = sbr.rel (%p1827_p10) target bundleno = 311 (0x137), region = 283  ;;  %s3577_s24 = smov (!%p1827_p10), %s3350_s23 }
 0x127   : > { %s3578_s4 = smov (!%p1827_p10), %s3347_s11  ;;  %s3359_s30 = smov (!%p1827_p10), 0  }
 0x128   : > { %s2420_s3 = smov (!%p1827_p10), 0  }
 0x12d LB: >> { %v1320_v57 = vld [vmem:[%s2414_s4] sm:$0xff]  ;;  %v1322_v29 = vld [vmem:[%s2414_s4 + $0x18] sm:$0xff]  ;;  %v1324_v27 = vld [vmem:[%s2414_s4 + $0x30] sm:$0xff]  ;;  %s1328_s5 = sadd.s32 1, %s2418_s30  ;;  %s1314_s3 = sadd.s32 1, %s2422_s3   ;;  %s2422_s3 = sphi %s2420_s3, %s1314_s3   ;;  %s2418_s30 = sphi %s3359_s30, %s3579_s30   ;;  %s2414_s4 = sphi %s3578_s4, %s1333_s4   ;;  %s2410_s24 = sphi %s3577_s24, %s1334_s24  }
 0x12e   : >> { %1321 = vst [vmem:[%s2410_s24] sm:$0xff] %v1320_v57  ;;  %1323 = vst [vmem:[%s2410_s24 + $0x28] sm:$0xff] %v1322_v29  ;;  %v1326_v31 = vld [vmem:[%s2414_s4 + $0x48] sm:$0xff]  ;;  %p1329_p11 = scmp.ge.s32.totalorder %s1328_s5, %s3343_s28  ;;  %p1313_p12 = scmp.ge.s32.totalorder %s1314_s3, %s3343_s28 }
 0x12f   : >> { %1325 = vst [vmem:[%s2410_s24 + $0x50] sm:$0xff] %v1324_v27  ;;  %1327 = vst [vmem:[%s2410_s24 + $0x78] sm:$0xff] %v1326_v31 }
 0x130   : >> { %s3606_s5 = smov (%p1329_p11, %s1328_s5), 0  ;;  %1316 = sbr.rel (!%p1313_p12) target bundleno = 301 (0x12d), region = 289 }
 0x131   : >> { %s1828_s18 = sshll.u32 %s3606_s5, 3  ;;  %s3579_s30 = smov %s3606_s5 }
 0x132   : >> { %s1333_s4 = scalar_lea.vmem %s3347_s11, %s1828_s18 [#allocation3]   ;;  %s1334_s24 = scalar_lea.vmem %s3350_s23, %s1828_s18  }
 0x137 PF: > { %1337 = sbr.rel (%p1148_p5) target bundleno = 368 (0x170), region = 139  ;;  %s1339_s12 = ssub.s32 (!%p1148_p5), %s3229_s19, %s3233_s17 }
 0x138   : > { %s1343_s6 = sshrl.u32 (!%p1148_p5), %s3229_s19, 3  ;;  %s3380_s14 = scalar_lea.vmem (!%p1148_p5), %s3117_s26, %s1339_s12 [#allocation3] }
 0x139   : > { %s3383_s20 = scalar_lea.vmem (!%p1148_p5), %s3227_s15, %s1339_s12  ;;  %s3387_s21 = sshrl.u32 (!%p1148_p5), %s1343_s6, 4 }
 0x13a   : > { %p1830_p13 = scmp.le.s32.totalorder (!%p1148_p5), %s3387_s21, 0 }
 0x13e   : > { %1727 = sbr.rel (%p1830_p13) target bundleno = 342 (0x156), region = 294  ;;  %s3580_s22 = smov (!%p1830_p13), %s3227_s15 }
 0x13f   : > { %s3581_s29 = smov (!%p1830_p13), %s3117_s26  ;;  %s3396_s27 = smov (!%p1830_p13), 0  }
 0x140   : > { %s3398_s7 = smov (!%p1830_p13), 0  }
 0x145 LB: >> { %v1356_v56 = vld [vmem:[%s2430_s29] sm:$0xff]  ;;  %v1358_v38 = vld [vmem:[%s2430_s29 + $0x8] sm:$0xff]  ;;  %v1360_v62 = vld [vmem:[%s2430_s29 + $0x10] sm:$0xff]  ;;  %s1484_s25 = sadd.s32 1, %s2434_s27  ;;  %s1350_s7 = sadd.s32 1, %s2438_s7   ;;  %s2438_s7 = sphi %s3398_s7, %s1350_s7   ;;  %s2434_s27 = sphi %s3396_s27, %s3584_s27   ;;  %s2430_s29 = sphi %s3581_s29, %s1489_s29   ;;  %s2426_s22 = sphi %s3580_s22, %s3583_s22  }
 0x146   : >> { %1357 = vst [vmem:[%s2426_s22] sm:$0xff] %v1356_v56  ;;  %1359 = vst [vmem:[%s2426_s22 + $0x8] sm:$0xff] %v1358_v38  ;;  %v1362_v11 = vld [vmem:[%s2430_s29 + $0x18] sm:$0xff]  ;;  %v1364_v35 = vld [vmem:[%s2430_s29 + $0x20] sm:$0xff]  ;;  %p3439_p0 = scmp.ge.s32.totalorder %s1484_s25, %s3387_s21  ;;  %p1349_p1 = scmp.ge.s32.totalorder %s1350_s7, %s3387_s21 }
 0x147   : >> { %1361 = vst [vmem:[%s2426_s22 + $0x10] sm:$0xff] %v1360_v62  ;;  %v1392_v8 = vld [vmem:[%s2430_s29 + $0x28] sm:$0xff]  ;;  %1363 = vst [vmem:[%s2426_s22 + $0x18] sm:$0xff] %v1362_v11  ;;  %v1394_v46 = vld [vmem:[%s2430_s29 + $0x30] sm:$0xff] }
 0x148   : >> { %1365 = vst [vmem:[%s2426_s22 + $0x20] sm:$0xff] %v1364_v35  ;;  %1389 = vst [vmem:[%s2426_s22 + $0x28] sm:$0xff] %v1362_v11  ;;  %v1396_v52 = vld [vmem:[%s2430_s29 + $0x38] sm:$0xff]  ;;  %v1424_v53 = vld [vmem:[%s2430_s29 + $0x40] sm:$0xff]  ;;  %s3608_s25 = smov (%p3439_p0, %s1484_s25), 0 }
 0x149   : >> { %1391 = vst [vmem:[%s2426_s22 + $0x30] sm:$0xff] %v1364_v35  ;;  %1393 = vst [vmem:[%s2426_s22 + $0x38] sm:$0xff] %v1392_v8  ;;  %v1426_v30 = vld [vmem:[%s2430_s29 + $0x48] sm:$0xff]  ;;  %v1428_v58 = vld [vmem:[%s2430_s29 + $0x50] sm:$0xff]  ;;  %s1831_s8 = sshll.u32 %s3608_s25, 7  ;;  %s3584_s27 = smov %s3608_s25 }
 0x14a   : >> { %1395 = vst [vmem:[%s2426_s22 + $0x40] sm:$0xff] %v1394_v46  ;;  %1397 = vst [vmem:[%s2426_s22 + $0x48] sm:$0xff] %v1396_v52  ;;  %v1456_v59 = vld [vmem:[%s2430_s29 + $0x58] sm:$0xff]  ;;  %v1458_v40 = vld [vmem:[%s2430_s29 + $0x60] sm:$0xff]  ;;  %s1490_s9 = scalar_lea.vmem %s3227_s15, %s1831_s8  }
 0x14b   : >> { %1421 = vst [vmem:[%s2426_s22 + $0x50] sm:$0xff] %v1394_v46  ;;  %1423 = vst [vmem:[%s2426_s22 + $0x58] sm:$0xff] %v1396_v52  ;;  %v1460_v25 = vld [vmem:[%s2430_s29 + $0x68] sm:$0xff]  ;;  %v1462_v45 = vld [vmem:[%s2430_s29 + $0x70] sm:$0xff] }
 0x14c   : >> { %1425 = vst [vmem:[%s2426_s22 + $0x60] sm:$0xff] %v1424_v53  ;;  %1427 = vst [vmem:[%s2426_s22 + $0x68] sm:$0xff] %v1426_v30  ;;  %v1464_v0 = vld [vmem:[%s2430_s29 + $0x78] sm:$0xff]  ;;  %v1466_v3 = vld [vmem:[%s2430_s29 + $0x80] sm:$0xff] }
 0x14d   : >> { %1429 = vst [vmem:[%s2426_s22 + $0x70] sm:$0xff] %v1428_v58  ;;  %1453 = vst [vmem:[%s2426_s22 + $0x78] sm:$0xff] %v1426_v30  ;;  %v1468_v2 = vld [vmem:[%s2430_s29 + $0x88] sm:$0xff]  ;;  %v1470_v36 = vld [vmem:[%s2430_s29 + $0x90] sm:$0xff] }
 0x14e   : >> { %1455 = vst [vmem:[%s2426_s22 + $0x80] sm:$0xff] %v1428_v58  ;;  %1457 = vst [vmem:[%s2426_s22 + $0x88] sm:$0xff] %v1456_v59  ;;  %v1472_v1 = vld [vmem:[%s2430_s29 + $0x98] sm:$0xff]  ;;  %v1474_v4 = vld [vmem:[%s2430_s29 + $0xa0] sm:$0xff] }
 0x14f   : >> { %1459 = vst [vmem:[%s2426_s22 + $0x90] sm:$0xff] %v1458_v40  ;;  %1461 = vst [vmem:[%s2426_s22 + $0x98] sm:$0xff] %v1460_v25  ;;  %v1476_v42 = vld [vmem:[%s2430_s29 + $0xa8] sm:$0xff]  ;;  %v1478_v22 = vld [vmem:[%s2430_s29 + $0xb0] sm:$0xff]  ;;  %1352 = sbr.rel (!%p1349_p1) target bundleno = 325 (0x145), region = 300 }
 0x150   : >> { %1463 = vst [vmem:[%s2426_s22 + $0xa0] sm:$0xff] %v1462_v45  ;;  %1465 = vst [vmem:[%s2426_s22 + $0xa8] sm:$0xff] %v1464_v0  ;;  %v1480_v15 = vld [vmem:[%s2430_s29 + $0xb8] sm:$0xff]  ;;  %v1482_v19 = vld [vmem:[%s2430_s29 + $0xc0] sm:$0xff]  ;;  %s1489_s29 = scalar_lea.vmem %s3117_s26, %s1831_s8 [#allocation3]  }
 0x151   : >> { %1467 = vst [vmem:[%s2426_s22 + $0xb0] sm:$0xff] %v1466_v3  ;;  %1469 = vst [vmem:[%s2426_s22 + $0xb8] sm:$0xff] %v1468_v2 }
 0x152   : >> { %1471 = vst [vmem:[%s2426_s22 + $0xc0] sm:$0xff] %v1470_v36  ;;  %1473 = vst [vmem:[%s2426_s22 + $0xc8] sm:$0xff] %v1472_v1 }
 0x153   : >> { %1475 = vst [vmem:[%s2426_s22 + $0xd0] sm:$0xff] %v1474_v4  ;;  %1477 = vst [vmem:[%s2426_s22 + $0xd8] sm:$0xff] %v1476_v42 }
 0x154   : >> { %1479 = vst [vmem:[%s2426_s22 + $0xe0] sm:$0xff] %v1478_v22  ;;  %1481 = vst [vmem:[%s2426_s22 + $0xe8] sm:$0xff] %v1480_v15 }
 0x155   : >> { %1483 = vst [vmem:[%s2426_s22 + $0xf0] sm:$0xff] %v1482_v19  ;;  %s3583_s22 = smov %s1490_s9 }
 0x156 PF: > { %s3490_s11 = sand.u32 15, %s1343_s6   ;;  %s1850_s23 = sshll.u32 %s3387_s21, 11 }
 0x157   : > { %s1495_s24 = sshra.s32 %s1850_s23, 4  ;;  %p1836_p2 = scmp.le.s32.totalorder %s3490_s11, 0 }
 0x158   : > { %s3494_s4 = scalar_lea.vmem %s3117_s26, %s1495_s24 [#allocation3]   ;;  %s3497_s30 = scalar_lea.vmem %s3227_s15, %s1495_s24  }
 0x159   : > { %1741 = sbr.rel (%p1836_p2) target bundleno = 362 (0x16a), region = 305  ;;  %s3585_s3 = smov (!%p1836_p2), %s3497_s30 }
 0x15a   : > { %s3586_s5 = smov (!%p1836_p2), %s3494_s4  ;;  %s3506_s18 = smov (!%p1836_p2), 0  }
 0x15b   : > { %s2452_s12 = smov (!%p1836_p2), 0  }
 0x160 LB: >> { %v1511_v10 = vld [vmem:[%s2446_s5] sm:$0xff]  ;;  %v1513_v60 = vld [vmem:[%s2446_s5 + $0x18] sm:$0xff]  ;;  %v1515_v7 = vld [vmem:[%s2446_s5 + $0x30] sm:$0xff]  ;;  %s1519_s6 = sadd.s32 1, %s2450_s18  ;;  %s1505_s12 = sadd.s32 1, %s2454_s12   ;;  %s2454_s12 = sphi %s2452_s12, %s1505_s12   ;;  %s2450_s18 = sphi %s3506_s18, %s3587_s18   ;;  %s2446_s5 = sphi %s3586_s5, %s1524_s5   ;;  %s2442_s3 = sphi %s3585_s3, %s1525_s3  }
 0x161   : >> { %1512 = vst [vmem:[%s2442_s3] sm:$0xff] %v1511_v10  ;;  %1514 = vst [vmem:[%s2442_s3 + $0x28] sm:$0xff] %v1513_v60  ;;  %v1517_v34 = vld [vmem:[%s2446_s5 + $0x48] sm:$0xff]  ;;  %p1520_p3 = scmp.ge.s32.totalorder %s1519_s6, %s3490_s11  ;;  %p1504_p4 = scmp.ge.s32.totalorder %s1505_s12, %s3490_s11 }
 0x162   : >> { %1516 = vst [vmem:[%s2442_s3 + $0x50] sm:$0xff] %v1515_v7  ;;  %1518 = vst [vmem:[%s2442_s3 + $0x78] sm:$0xff] %v1517_v34 }
 0x163   : >> { %s3610_s6 = smov (%p1520_p3, %s1519_s6), 0  ;;  %1507 = sbr.rel (!%p1504_p4) target bundleno = 352 (0x160), region = 311 }
 0x164   : >> { %s1837_s21 = sshll.u32 %s3610_s6, 3  ;;  %s3587_s18 = smov %s3610_s6 }
 0x165   : >> { %s1524_s5 = scalar_lea.vmem %s3494_s4, %s1837_s21 [#allocation3]   ;;  %s1525_s3 = scalar_lea.vmem %s3497_s30, %s1837_s21  }
 0x16a PF: > { %s2459_s22 = smov 0  }
 0x16b   : > { %s1526_s29 = sshllo.u32 %s2459_s22, %s3233_s17 }
 0x16c   : > { %v1535_v37 = vld [vmem:[%s3380_s14] sm:%s1526_s29]  ;;  %v1537_v16 = vld [vmem:[%s3380_s14 + $0x18] sm:%s1526_s29] }
 0x16d   : > { %1536 = vst [vmem:[%s3383_s20] sm:%s1526_s29] %v1535_v37  ;;  %1538 = vst [vmem:[%s3383_s20 + $0x28] sm:%s1526_s29] %v1537_v16 }
 0x16e   : > { %v1539_v24 = vld [vmem:[%s3380_s14 + $0x30] sm:%s1526_s29]  ;;  %v1541_v28 = vld [vmem:[%s3380_s14 + $0x48] sm:%s1526_s29] }
 0x16f   : > { %1540 = vst [vmem:[%s3383_s20 + $0x50] sm:%s1526_s29] %v1539_v24  ;;  %1542 = vst [vmem:[%s3383_s20 + $0x78] sm:%s1526_s29] %v1541_v28 }
 0x170 PF: > { %p1839_p5 = scmp.ge.u32.totalorder %s3229_s19, 8 }
 0x171   : > { %s2460_s27 = smov (!%p1839_p5), 0  }
 0x172   : > { %1129 = sbr.rel (%p1839_p5) target bundleno = 377 (0x179), region = 110  ;;  %s1130_s17 = sshllo.u32 (!%p1839_p5), %s2460_s27, %s3229_s19 }
 0x173   : > { %v1139_v47 = vld [vmem:[%s3117_s26] sm:%s1130_s17] (!%p1839_p5)  ;;  %v1141_v6 = vld [vmem:[%s3117_s26 + $0x18] sm:%s1130_s17] (!%p1839_p5) }
 0x174   : > { %1140 = vst [vmem:[%s3227_s15] sm:%s1130_s17] (!%p1839_p5), %v1139_v47  ;;  %1142 = vst [vmem:[%s3227_s15 + $0x28] sm:%s1130_s17] (!%p1839_p5), %v1141_v6 }
 0x175   : > { %v1143_v50 = vld [vmem:[%s3117_s26 + $0x30] sm:%s1130_s17] (!%p1839_p5)  ;;  %v1145_v18 = vld [vmem:[%s3117_s26 + $0x48] sm:%s1130_s17] (!%p1839_p5) }
 0x176   : > { %1144 = vst [vmem:[%s3227_s15 + $0x50] sm:%s1130_s17] (!%p1839_p5), %v1143_v50  ;;  %1146 = vst [vmem:[%s3227_s15 + $0x78] sm:%s1130_s17] (!%p1839_p5), %v1145_v18 }
 0x179 PF: > { %p9_p6 = scmp.ge.s32.totalorder %s2495_s13, 4   ;;  %s3588_s9 = smov %s2322_s10 }
 0x17a   : > { %s3589_s10 = smov %s2505_s16  ;;  %s3590_s11 = smov %s2495_s13 }
 0x17b   :  { %11 = sbr.rel (!%p9_p6) target bundleno = 2 (0x2), region = 322 }

</bundles_post_ra>
